<compile_context>
chip_gen: v5e
topology: v5e:2x2
jax: 0.10.0
libtpu: 0.0.40
codegen_flags: <defaults>
</compile_context>

<pallas_src>
import jax
import jax.numpy as jnp
import numpy as np
from jax.experimental import pallas as pl
from jax.experimental.pallas import tpu as pltpu


# ---------------------------------------------------------------------------
# Glue: ball-query neighbor search (PyTorch ball_query semantics: first
# `nsample` points within `radius`, in original order, padded with the first
# valid neighbor).  TODO(synk): O(N^2) neighbor search stays in plain JAX.
# ---------------------------------------------------------------------------
def ball_query(p, radius, nsample):
    B, N, _ = p.shape
    d2 = jnp.sum((p[:, :, None, :] - p[:, None, :, :]) ** 2, axis=-1)   # (B,N,N)
    within = d2 <= radius * radius
    order = jnp.arange(N, dtype=jnp.int32)
    key = jnp.where(within, order[None, None, :], order[None, None, :] + N)
    key_sorted = jnp.sort(key, axis=-1)[:, :, :nsample]
    idx = jnp.argsort(key, axis=-1)[:, :, :nsample].astype(jnp.int32)
    valid = key_sorted < N
    idx = jnp.where(valid, idx, idx[:, :, :1])   # pad with first valid neighbor
    return idx                                   # (B, N, nsample)


# ---------------------------------------------------------------------------
# BN folding: inference-mode BatchNorm (+conv bias) is a per-output-channel
# scale/shift.  Fold the scale into the weight columns once, in the wrapper.
# ---------------------------------------------------------------------------
def fold_bn(params):
    return {
        "w1": (params["w1"] * params["s1"]).astype(jnp.bfloat16),
        "h1": params["h1"].astype(jnp.float32),
        "w2": (params["w2"] * params["s2"]).astype(jnp.bfloat16),
        "h2": params["h2"].astype(jnp.float32),
        "w3": (params["w3"] * params["s3"]).astype(jnp.bfloat16),
        "h3": params["h3"].astype(jnp.float32),
    }


def _choose_tn(N, K, C, Cm, budget_bytes=40 << 20):
    """Largest point-tile that fits a conservative VMEM budget (all chips)."""
    cin = 3 + C
    # double-buffered bf16 weights + f32 shifts
    fixed = 2 * 2 * (cin * C + C * Cm + Cm * C) + 2 * 4 * (2 * C + Cm)
    # per-point bytes: bf16 agg tile + f32 identity + f32 output (x2 buffers)
    per_pt = 2 * (K * cin * 2 + C * 4 + C * 4)
    tn = (budget_bytes - fixed) // per_pt
    tn = int(min(max(tn, 8), N))
    if tn >= N:
        return N
    tn = (tn // 8) * 8
    while tn > 8 and N % tn:
        tn -= 8
    return tn if tn >= 8 and N % tn == 0 else N


# ---------------------------------------------------------------------------
# Pallas kernel: fused LocalAggregation + pwconv + residual + act.
# Block view (batch dim squeezed):
#   agg_ref : (K, tn, 3+C) bf16   id_ref : (tn, C) f32   out_ref : (tn, C) f32
# ---------------------------------------------------------------------------
def _inv_res_mlp_kernel(agg_ref, id_ref,
                        w1_ref, h1_ref,
                        w2_ref, h2_ref,
                        w3_ref, h3_ref,
                        out_ref):
    K = agg_ref.shape[0]
    w1 = w1_ref[...]
    h1 = h1_ref[...]
    # LocalAggregation: per-neighbor 1x1 conv (BN folded) + ReLU, running
    # elementwise max over the K neighbors (VALU vmax, no XLU reduce; keeps
    # the live f32 intermediate at (tn, C)).
    fmax = None
    for k in range(K):                       # static unroll, static slices
        yk = jnp.dot(agg_ref[k], w1, preferred_element_type=jnp.float32)
        yk = jnp.maximum(yk + h1, 0.0)
        fmax = yk if fmax is None else jnp.maximum(fmax, yk)
    # pwconv[0]: 1x1 conv (BN folded) + ReLU
    g = jnp.dot(fmax.astype(jnp.bfloat16), w2_ref[...],
                preferred_element_type=jnp.float32)
    g = jnp.maximum(g + h2_ref[...], 0.0)
    # pwconv[1]: 1x1 conv (BN folded), no activation
    h = jnp.dot(g.astype(jnp.bfloat16), w3_ref[...],
                preferred_element_type=jnp.float32)
    h = h + h3_ref[...]
    # residual + final ReLU (f32)
    out_ref[...] = jnp.maximum(h + id_ref[...], 0.0)


def inv_res_mlp(p, f, params, *, radius, nsample, tn=None):
    """p: (B, N, 3) float32, f: (B, N, C) float32 -> (B, N, C) float32."""
    B, N, C = f.shape
    K = nsample
    cin = 3 + C
    fw = fold_bn(params)
    Cm = fw["w2"].shape[1]
    if tn is None:
        tn = _choose_tn(N, K, C, Cm)
    assert N % tn == 0, (N, tn)

    # ---- glue: grouping / gather, built directly in (B, K, N, 3+C) layout ----
    idx = ball_query(p, radius, nsample)                     # (B, N, K)
    idx_t = jnp.swapaxes(idx, 1, 2)                          # (B, K, N)
    bidx = jnp.arange(B, dtype=jnp.int32)[:, None, None]
    grouped_xyz = p[bidx, idx_t]                             # (B, K, N, 3)
    fj = f[bidx, idx_t]                                      # (B, K, N, C)
    dp = grouped_xyz - p[:, None, :, :]                      # relative coords
    agg = jnp.concatenate([dp, fj], axis=-1).astype(jnp.bfloat16)  # (B,K,N,3+C)

    const = lambda b, n: (0, 0)
    grid = (B, N // tn)
    out = pl.pallas_call(
        _inv_res_mlp_kernel,
        out_shape=jax.ShapeDtypeStruct((B, N, C), jnp.float32),
        grid_spec=pltpu.PrefetchScalarGridSpec(
            num_scalar_prefetch=0,
            grid=grid,
            in_specs=[
                pl.BlockSpec((None, K, tn, cin), lambda b, n: (b, 0, n, 0)),
                pl.BlockSpec((None, tn, C), lambda b, n: (b, n, 0)),
                pl.BlockSpec((cin, C), const),
                pl.BlockSpec((1, C), const),
                pl.BlockSpec((C, Cm), const),
                pl.BlockSpec((1, Cm), const),
                pl.BlockSpec((Cm, C), const),
                pl.BlockSpec((1, C), const),
            ],
            out_specs=pl.BlockSpec((None, tn, C), lambda b, n: (b, n, 0)),
        ),
        compiler_params=pltpu.CompilerParams(
            dimension_semantics=("parallel", "parallel"),
            vmem_limit_bytes=48 * 1024 * 1024),
    )(agg, f,
      fw["w1"], fw["h1"], fw["w2"], fw["h2"], fw["w3"], fw["h3"])
    return out


# ---------------------------------------------------------------------------
# Pure-JAX reference (same folded-BN / bf16-matmul math, no Pallas).
# ---------------------------------------------------------------------------
def inv_res_mlp_reference(p, f, fw, *, radius, nsample):
    B, N, C = f.shape
    idx = ball_query(p, radius, nsample)
    bidx = jnp.arange(B, dtype=jnp.int32)[:, None, None]
    dp = p[bidx, idx] - p[:, :, None, :]
    fj = f[bidx, idx]
    agg = jnp.concatenate([dp, fj], axis=-1).astype(jnp.bfloat16)  # (B,N,K,3+C)
    y = jnp.einsum("bnkc,cd->bnkd", agg, fw["w1"],
                   preferred_element_type=jnp.float32)
    y = jnp.maximum(y + fw["h1"], 0.0)
    fa = jnp.max(y, axis=2)                                        # (B, N, C)
    g = jnp.einsum("bnc,cd->bnd", fa.astype(jnp.bfloat16), fw["w2"],
                   preferred_element_type=jnp.float32)
    g = jnp.maximum(g + fw["h2"], 0.0)
    h = jnp.einsum("bnc,cd->bnd", g.astype(jnp.bfloat16), fw["w3"],
                   preferred_element_type=jnp.float32)
    h = h + fw["h3"]
    return jnp.maximum(h + f, 0.0)


def make_params(key, C, expansion):
    Cm = C * expansion
    cin = 3 + C
    ks = jax.random.split(key, 9)
    def w(k, shape, fan_in):
        return (jax.random.normal(k, shape, jnp.float32) / np.sqrt(fan_in)).astype(jnp.float32)
    def affine(k, n):
        a, b = jax.random.split(k)
        scale = 1.0 + 0.05 * jax.random.normal(a, (1, n), jnp.float32)
        shift = 0.05 * jax.random.normal(b, (1, n), jnp.float32)
        return scale, shift
    s1, h1 = affine(ks[1], C)
    s2, h2 = affine(ks[3], Cm)
    s3, h3 = affine(ks[5], C)
    return {
        "w1": w(ks[0], (cin, C), cin), "s1": s1, "h1": h1,
        "w2": w(ks[2], (C, Cm), C),    "s2": s2, "h2": h2,
        "w3": w(ks[4], (Cm, C), Cm),   "s3": s3, "h3": h3,
    }


if __name__ == "__main__":
    B, N, C = 2, 64, 32
    K = 16           # nsample
    radius = 0.25
    expansion = 4    # mid_channels = 128

    key = jax.random.PRNGKey(0)
    kp, kf, kw = jax.random.split(key, 3)
    p = jax.random.uniform(kp, (B, N, 3), jnp.float32)        # points in unit cube
    f = jax.random.normal(kf, (B, N, C), jnp.float32)         # features (B, N, C)
    params = make_params(kw, C, expansion)

    out = inv_res_mlp(p, f, params, radius=radius, nsample=K)
    out = jax.block_until_ready(out)

    ref = jax.block_until_ready(
        inv_res_mlp_reference(p, f, fold_bn(params), radius=radius, nsample=K))
    np.testing.assert_allclose(np.asarray(out), np.asarray(ref),
                               rtol=5e-3, atol=5e-3)
    print("KERNEL_OK")
</pallas_src>

<mosaic_0001>
module attributes {stable_mosaic.version = 11 : i64} {
  func.func @_inv_res_mlp_kernel(%arg0: i32, %arg1: i32, %arg2: memref<1x16x64x35xbf16, #tpu.memory_space<vmem>>, %arg3: memref<1x64x32xf32, #tpu.memory_space<vmem>>, %arg4: memref<35x32xbf16, #tpu.memory_space<vmem>>, %arg5: memref<1x32xf32, #tpu.memory_space<vmem>>, %arg6: memref<32x128xbf16, #tpu.memory_space<vmem>>, %arg7: memref<1x128xf32, #tpu.memory_space<vmem>>, %arg8: memref<128x32xbf16, #tpu.memory_space<vmem>>, %arg9: memref<1x32xf32, #tpu.memory_space<vmem>>, %arg10: memref<1x64x32xf32, #tpu.memory_space<vmem>>) attributes {dimension_semantics = [#tpu.dimension_semantics<parallel>, #tpu.dimension_semantics<parallel>], iteration_bounds = array<i64: 2, 1>, scalar_prefetch = 0 : i64, scratch_operands = 0 : i64, tpu.core_type = #tpu.core_type<tc>, window_params = [{transform_indices = @transform_0, window_bounds = array<i64: 1, 16, 64, 35>}, {transform_indices = @transform_1, window_bounds = array<i64: 1, 64, 32>}, {pipeline_mode = #tpu.pipeline_mode<synchronous>, transform_indices = @transform_2, window_bounds = array<i64: 35, 32>}, {pipeline_mode = #tpu.pipeline_mode<synchronous>, transform_indices = @transform_3, window_bounds = array<i64: 1, 32>}, {pipeline_mode = #tpu.pipeline_mode<synchronous>, transform_indices = @transform_4, window_bounds = array<i64: 32, 128>}, {pipeline_mode = #tpu.pipeline_mode<synchronous>, transform_indices = @transform_5, window_bounds = array<i64: 1, 128>}, {pipeline_mode = #tpu.pipeline_mode<synchronous>, transform_indices = @transform_6, window_bounds = array<i64: 128, 32>}, {pipeline_mode = #tpu.pipeline_mode<synchronous>, transform_indices = @transform_7, window_bounds = array<i64: 1, 32>}, {transform_indices = @transform_8, window_bounds = array<i64: 1, 64, 32>}]} {
    %c0 = arith.constant 0 : index
    %c0_0 = arith.constant 0 : index
    %0 = vector.load %arg4[%c0, %c0_0] : memref<35x32xbf16, #tpu.memory_space<vmem>>, vector<35x32xbf16>
    %c0_1 = arith.constant 0 : index
    %c0_2 = arith.constant 0 : index
    %1 = vector.load %arg5[%c0_1, %c0_2] : memref<1x32xf32, #tpu.memory_space<vmem>>, vector<1x32xf32>
    %c0_3 = arith.constant 0 : index
    %c0_4 = arith.constant 0 : index
    %c0_5 = arith.constant 0 : index
    %c0_6 = arith.constant 0 : index
    %2 = vector.load %arg2[%c0_3, %c0_4, %c0_5, %c0_6] : memref<1x16x64x35xbf16, #tpu.memory_space<vmem>>, vector<1x1x64x35xbf16>
    %3 = vector.shape_cast %2 : vector<1x1x64x35xbf16> to vector<64x35xbf16>
    %cst = arith.constant dense<0.000000e+00> : vector<64x32xf32>
    %4 = tpu.matmul %3, %0, %cst {dimension_numbers = #tpu.dot_dimension_numbers<[1], [0], [0], [1], [0, 0, 1, 1], [], []>} : vector<64x35xbf16>, vector<35x32xbf16>, vector<64x32xf32> -> vector<64x32xf32>
    %5 = vector.broadcast %1 : vector<1x32xf32> to vector<64x32xf32>
    %6 = arith.addf %4, %5 : vector<64x32xf32>
    %cst_7 = arith.constant 0.000000e+00 : f32
    %7 = vector.broadcast %cst_7 : f32 to vector<64x32xf32>
    %8 = arith.maximumf %6, %7 : vector<64x32xf32>
    %c0_8 = arith.constant 0 : index
    %c1 = arith.constant 1 : index
    %c0_9 = arith.constant 0 : index
    %c0_10 = arith.constant 0 : index
    %9 = vector.load %arg2[%c0_8, %c1, %c0_9, %c0_10] : memref<1x16x64x35xbf16, #tpu.memory_space<vmem>>, vector<1x1x64x35xbf16>
    %10 = vector.shape_cast %9 : vector<1x1x64x35xbf16> to vector<64x35xbf16>
    %cst_11 = arith.constant dense<0.000000e+00> : vector<64x32xf32>
    %11 = tpu.matmul %10, %0, %cst_11 {dimension_numbers = #tpu.dot_dimension_numbers<[1], [0], [0], [1], [0, 0, 1, 1], [], []>} : vector<64x35xbf16>, vector<35x32xbf16>, vector<64x32xf32> -> vector<64x32xf32>
    %12 = vector.broadcast %1 : vector<1x32xf32> to vector<64x32xf32>
    %13 = arith.addf %11, %12 : vector<64x32xf32>
    %cst_12 = arith.constant 0.000000e+00 : f32
    %14 = vector.broadcast %cst_12 : f32 to vector<64x32xf32>
    %15 = arith.maximumf %13, %14 : vector<64x32xf32>
    %16 = arith.maximumf %8, %15 : vector<64x32xf32>
    %c0_13 = arith.constant 0 : index
    %c2 = arith.constant 2 : index
    %c0_14 = arith.constant 0 : index
    %c0_15 = arith.constant 0 : index
    %17 = vector.load %arg2[%c0_13, %c2, %c0_14, %c0_15] : memref<1x16x64x35xbf16, #tpu.memory_space<vmem>>, vector<1x1x64x35xbf16>
    %18 = vector.shape_cast %17 : vector<1x1x64x35xbf16> to vector<64x35xbf16>
    %cst_16 = arith.constant dense<0.000000e+00> : vector<64x32xf32>
    %19 = tpu.matmul %18, %0, %cst_16 {dimension_numbers = #tpu.dot_dimension_numbers<[1], [0], [0], [1], [0, 0, 1, 1], [], []>} : vector<64x35xbf16>, vector<35x32xbf16>, vector<64x32xf32> -> vector<64x32xf32>
    %20 = vector.broadcast %1 : vector<1x32xf32> to vector<64x32xf32>
    %21 = arith.addf %19, %20 : vector<64x32xf32>
    %cst_17 = arith.constant 0.000000e+00 : f32
    %22 = vector.broadcast %cst_17 : f32 to vector<64x32xf32>
    %23 = arith.maximumf %21, %22 : vector<64x32xf32>
    %24 = arith.maximumf %16, %23 : vector<64x32xf32>
    %c0_18 = arith.constant 0 : index
    %c3 = arith.constant 3 : index
    %c0_19 = arith.constant 0 : index
    %c0_20 = arith.constant 0 : index
    %25 = vector.load %arg2[%c0_18, %c3, %c0_19, %c0_20] : memref<1x16x64x35xbf16, #tpu.memory_space<vmem>>, vector<1x1x64x35xbf16>
    %26 = vector.shape_cast %25 : vector<1x1x64x35xbf16> to vector<64x35xbf16>
    %cst_21 = arith.constant dense<0.000000e+00> : vector<64x32xf32>
    %27 = tpu.matmul %26, %0, %cst_21 {dimension_numbers = #tpu.dot_dimension_numbers<[1], [0], [0], [1], [0, 0, 1, 1], [], []>} : vector<64x35xbf16>, vector<35x32xbf16>, vector<64x32xf32> -> vector<64x32xf32>
    %28 = vector.broadcast %1 : vector<1x32xf32> to vector<64x32xf32>
    %29 = arith.addf %27, %28 : vector<64x32xf32>
    %cst_22 = arith.constant 0.000000e+00 : f32
    %30 = vector.broadcast %cst_22 : f32 to vector<64x32xf32>
    %31 = arith.maximumf %29, %30 : vector<64x32xf32>
    %32 = arith.maximumf %24, %31 : vector<64x32xf32>
    %c0_23 = arith.constant 0 : index
    %c4 = arith.constant 4 : index
    %c0_24 = arith.constant 0 : index
    %c0_25 = arith.constant 0 : index
    %33 = vector.load %arg2[%c0_23, %c4, %c0_24, %c0_25] : memref<1x16x64x35xbf16, #tpu.memory_space<vmem>>, vector<1x1x64x35xbf16>
    %34 = vector.shape_cast %33 : vector<1x1x64x35xbf16> to vector<64x35xbf16>
    %cst_26 = arith.constant dense<0.000000e+00> : vector<64x32xf32>
    %35 = tpu.matmul %34, %0, %cst_26 {dimension_numbers = #tpu.dot_dimension_numbers<[1], [0], [0], [1], [0, 0, 1, 1], [], []>} : vector<64x35xbf16>, vector<35x32xbf16>, vector<64x32xf32> -> vector<64x32xf32>
    %36 = vector.broadcast %1 : vector<1x32xf32> to vector<64x32xf32>
    %37 = arith.addf %35, %36 : vector<64x32xf32>
    %cst_27 = arith.constant 0.000000e+00 : f32
    %38 = vector.broadcast %cst_27 : f32 to vector<64x32xf32>
    %39 = arith.maximumf %37, %38 : vector<64x32xf32>
    %40 = arith.maximumf %32, %39 : vector<64x32xf32>
    %c0_28 = arith.constant 0 : index
    %c5 = arith.constant 5 : index
    %c0_29 = arith.constant 0 : index
    %c0_30 = arith.constant 0 : index
    %41 = vector.load %arg2[%c0_28, %c5, %c0_29, %c0_30] : memref<1x16x64x35xbf16, #tpu.memory_space<vmem>>, vector<1x1x64x35xbf16>
    %42 = vector.shape_cast %41 : vector<1x1x64x35xbf16> to vector<64x35xbf16>
    %cst_31 = arith.constant dense<0.000000e+00> : vector<64x32xf32>
    %43 = tpu.matmul %42, %0, %cst_31 {dimension_numbers = #tpu.dot_dimension_numbers<[1], [0], [0], [1], [0, 0, 1, 1], [], []>} : vector<64x35xbf16>, vector<35x32xbf16>, vector<64x32xf32> -> vector<64x32xf32>
    %44 = vector.broadcast %1 : vector<1x32xf32> to vector<64x32xf32>
    %45 = arith.addf %43, %44 : vector<64x32xf32>
    %cst_32 = arith.constant 0.000000e+00 : f32
    %46 = vector.broadcast %cst_32 : f32 to vector<64x32xf32>
    %47 = arith.maximumf %45, %46 : vector<64x32xf32>
    %48 = arith.maximumf %40, %47 : vector<64x32xf32>
    %c0_33 = arith.constant 0 : index
    %c6 = arith.constant 6 : index
    %c0_34 = arith.constant 0 : index
    %c0_35 = arith.constant 0 : index
    %49 = vector.load %arg2[%c0_33, %c6, %c0_34, %c0_35] : memref<1x16x64x35xbf16, #tpu.memory_space<vmem>>, vector<1x1x64x35xbf16>
    %50 = vector.shape_cast %49 : vector<1x1x64x35xbf16> to vector<64x35xbf16>
    %cst_36 = arith.constant dense<0.000000e+00> : vector<64x32xf32>
    %51 = tpu.matmul %50, %0, %cst_36 {dimension_numbers = #tpu.dot_dimension_numbers<[1], [0], [0], [1], [0, 0, 1, 1], [], []>} : vector<64x35xbf16>, vector<35x32xbf16>, vector<64x32xf32> -> vector<64x32xf32>
    %52 = vector.broadcast %1 : vector<1x32xf32> to vector<64x32xf32>
    %53 = arith.addf %51, %52 : vector<64x32xf32>
    %cst_37 = arith.constant 0.000000e+00 : f32
    %54 = vector.broadcast %cst_37 : f32 to vector<64x32xf32>
    %55 = arith.maximumf %53, %54 : vector<64x32xf32>
    %56 = arith.maximumf %48, %55 : vector<64x32xf32>
    %c0_38 = arith.constant 0 : index
    %c7 = arith.constant 7 : index
    %c0_39 = arith.constant 0 : index
    %c0_40 = arith.constant 0 : index
    %57 = vector.load %arg2[%c0_38, %c7, %c0_39, %c0_40] : memref<1x16x64x35xbf16, #tpu.memory_space<vmem>>, vector<1x1x64x35xbf16>
    %58 = vector.shape_cast %57 : vector<1x1x64x35xbf16> to vector<64x35xbf16>
    %cst_41 = arith.constant dense<0.000000e+00> : vector<64x32xf32>
    %59 = tpu.matmul %58, %0, %cst_41 {dimension_numbers = #tpu.dot_dimension_numbers<[1], [0], [0], [1], [0, 0, 1, 1], [], []>} : vector<64x35xbf16>, vector<35x32xbf16>, vector<64x32xf32> -> vector<64x32xf32>
    %60 = vector.broadcast %1 : vector<1x32xf32> to vector<64x32xf32>
    %61 = arith.addf %59, %60 : vector<64x32xf32>
    %cst_42 = arith.constant 0.000000e+00 : f32
    %62 = vector.broadcast %cst_42 : f32 to vector<64x32xf32>
    %63 = arith.maximumf %61, %62 : vector<64x32xf32>
    %64 = arith.maximumf %56, %63 : vector<64x32xf32>
    %c0_43 = arith.constant 0 : index
    %c8 = arith.constant 8 : index
    %c0_44 = arith.constant 0 : index
    %c0_45 = arith.constant 0 : index
    %65 = vector.load %arg2[%c0_43, %c8, %c0_44, %c0_45] : memref<1x16x64x35xbf16, #tpu.memory_space<vmem>>, vector<1x1x64x35xbf16>
    %66 = vector.shape_cast %65 : vector<1x1x64x35xbf16> to vector<64x35xbf16>
    %cst_46 = arith.constant dense<0.000000e+00> : vector<64x32xf32>
    %67 = tpu.matmul %66, %0, %cst_46 {dimension_numbers = #tpu.dot_dimension_numbers<[1], [0], [0], [1], [0, 0, 1, 1], [], []>} : vector<64x35xbf16>, vector<35x32xbf16>, vector<64x32xf32> -> vector<64x32xf32>
    %68 = vector.broadcast %1 : vector<1x32xf32> to vector<64x32xf32>
    %69 = arith.addf %67, %68 : vector<64x32xf32>
    %cst_47 = arith.constant 0.000000e+00 : f32
    %70 = vector.broadcast %cst_47 : f32 to vector<64x32xf32>
    %71 = arith.maximumf %69, %70 : vector<64x32xf32>
    %72 = arith.maximumf %64, %71 : vector<64x32xf32>
    %c0_48 = arith.constant 0 : index
    %c9 = arith.constant 9 : index
    %c0_49 = arith.constant 0 : index
    %c0_50 = arith.constant 0 : index
    %73 = vector.load %arg2[%c0_48, %c9, %c0_49, %c0_50] : memref<1x16x64x35xbf16, #tpu.memory_space<vmem>>, vector<1x1x64x35xbf16>
    %74 = vector.shape_cast %73 : vector<1x1x64x35xbf16> to vector<64x35xbf16>
    %cst_51 = arith.constant dense<0.000000e+00> : vector<64x32xf32>
    %75 = tpu.matmul %74, %0, %cst_51 {dimension_numbers = #tpu.dot_dimension_numbers<[1], [0], [0], [1], [0, 0, 1, 1], [], []>} : vector<64x35xbf16>, vector<35x32xbf16>, vector<64x32xf32> -> vector<64x32xf32>
    %76 = vector.broadcast %1 : vector<1x32xf32> to vector<64x32xf32>
    %77 = arith.addf %75, %76 : vector<64x32xf32>
    %cst_52 = arith.constant 0.000000e+00 : f32
    %78 = vector.broadcast %cst_52 : f32 to vector<64x32xf32>
    %79 = arith.maximumf %77, %78 : vector<64x32xf32>
    %80 = arith.maximumf %72, %79 : vector<64x32xf32>
    %c0_53 = arith.constant 0 : index
    %c10 = arith.constant 10 : index
    %c0_54 = arith.constant 0 : index
    %c0_55 = arith.constant 0 : index
    %81 = vector.load %arg2[%c0_53, %c10, %c0_54, %c0_55] : memref<1x16x64x35xbf16, #tpu.memory_space<vmem>>, vector<1x1x64x35xbf16>
    %82 = vector.shape_cast %81 : vector<1x1x64x35xbf16> to vector<64x35xbf16>
    %cst_56 = arith.constant dense<0.000000e+00> : vector<64x32xf32>
    %83 = tpu.matmul %82, %0, %cst_56 {dimension_numbers = #tpu.dot_dimension_numbers<[1], [0], [0], [1], [0, 0, 1, 1], [], []>} : vector<64x35xbf16>, vector<35x32xbf16>, vector<64x32xf32> -> vector<64x32xf32>
    %84 = vector.broadcast %1 : vector<1x32xf32> to vector<64x32xf32>
    %85 = arith.addf %83, %84 : vector<64x32xf32>
    %cst_57 = arith.constant 0.000000e+00 : f32
    %86 = vector.broadcast %cst_57 : f32 to vector<64x32xf32>
    %87 = arith.maximumf %85, %86 : vector<64x32xf32>
    %88 = arith.maximumf %80, %87 : vector<64x32xf32>
    %c0_58 = arith.constant 0 : index
    %c11 = arith.constant 11 : index
    %c0_59 = arith.constant 0 : index
    %c0_60 = arith.constant 0 : index
    %89 = vector.load %arg2[%c0_58, %c11, %c0_59, %c0_60] : memref<1x16x64x35xbf16, #tpu.memory_space<vmem>>, vector<1x1x64x35xbf16>
    %90 = vector.shape_cast %89 : vector<1x1x64x35xbf16> to vector<64x35xbf16>
    %cst_61 = arith.constant dense<0.000000e+00> : vector<64x32xf32>
    %91 = tpu.matmul %90, %0, %cst_61 {dimension_numbers = #tpu.dot_dimension_numbers<[1], [0], [0], [1], [0, 0, 1, 1], [], []>} : vector<64x35xbf16>, vector<35x32xbf16>, vector<64x32xf32> -> vector<64x32xf32>
    %92 = vector.broadcast %1 : vector<1x32xf32> to vector<64x32xf32>
    %93 = arith.addf %91, %92 : vector<64x32xf32>
    %cst_62 = arith.constant 0.000000e+00 : f32
    %94 = vector.broadcast %cst_62 : f32 to vector<64x32xf32>
    %95 = arith.maximumf %93, %94 : vector<64x32xf32>
    %96 = arith.maximumf %88, %95 : vector<64x32xf32>
    %c0_63 = arith.constant 0 : index
    %c12 = arith.constant 12 : index
    %c0_64 = arith.constant 0 : index
    %c0_65 = arith.constant 0 : index
    %97 = vector.load %arg2[%c0_63, %c12, %c0_64, %c0_65] : memref<1x16x64x35xbf16, #tpu.memory_space<vmem>>, vector<1x1x64x35xbf16>
    %98 = vector.shape_cast %97 : vector<1x1x64x35xbf16> to vector<64x35xbf16>
    %cst_66 = arith.constant dense<0.000000e+00> : vector<64x32xf32>
    %99 = tpu.matmul %98, %0, %cst_66 {dimension_numbers = #tpu.dot_dimension_numbers<[1], [0], [0], [1], [0, 0, 1, 1], [], []>} : vector<64x35xbf16>, vector<35x32xbf16>, vector<64x32xf32> -> vector<64x32xf32>
    %100 = vector.broadcast %1 : vector<1x32xf32> to vector<64x32xf32>
    %101 = arith.addf %99, %100 : vector<64x32xf32>
    %cst_67 = arith.constant 0.000000e+00 : f32
    %102 = vector.broadcast %cst_67 : f32 to vector<64x32xf32>
    %103 = arith.maximumf %101, %102 : vector<64x32xf32>
    %104 = arith.maximumf %96, %103 : vector<64x32xf32>
    %c0_68 = arith.constant 0 : index
    %c13 = arith.constant 13 : index
    %c0_69 = arith.constant 0 : index
    %c0_70 = arith.constant 0 : index
    %105 = vector.load %arg2[%c0_68, %c13, %c0_69, %c0_70] : memref<1x16x64x35xbf16, #tpu.memory_space<vmem>>, vector<1x1x64x35xbf16>
    %106 = vector.shape_cast %105 : vector<1x1x64x35xbf16> to vector<64x35xbf16>
    %cst_71 = arith.constant dense<0.000000e+00> : vector<64x32xf32>
    %107 = tpu.matmul %106, %0, %cst_71 {dimension_numbers = #tpu.dot_dimension_numbers<[1], [0], [0], [1], [0, 0, 1, 1], [], []>} : vector<64x35xbf16>, vector<35x32xbf16>, vector<64x32xf32> -> vector<64x32xf32>
    %108 = vector.broadcast %1 : vector<1x32xf32> to vector<64x32xf32>
    %109 = arith.addf %107, %108 : vector<64x32xf32>
    %cst_72 = arith.constant 0.000000e+00 : f32
    %110 = vector.broadcast %cst_72 : f32 to vector<64x32xf32>
    %111 = arith.maximumf %109, %110 : vector<64x32xf32>
    %112 = arith.maximumf %104, %111 : vector<64x32xf32>
    %c0_73 = arith.constant 0 : index
    %c14 = arith.constant 14 : index
    %c0_74 = arith.constant 0 : index
    %c0_75 = arith.constant 0 : index
    %113 = vector.load %arg2[%c0_73, %c14, %c0_74, %c0_75] : memref<1x16x64x35xbf16, #tpu.memory_space<vmem>>, vector<1x1x64x35xbf16>
    %114 = vector.shape_cast %113 : vector<1x1x64x35xbf16> to vector<64x35xbf16>
    %cst_76 = arith.constant dense<0.000000e+00> : vector<64x32xf32>
    %115 = tpu.matmul %114, %0, %cst_76 {dimension_numbers = #tpu.dot_dimension_numbers<[1], [0], [0], [1], [0, 0, 1, 1], [], []>} : vector<64x35xbf16>, vector<35x32xbf16>, vector<64x32xf32> -> vector<64x32xf32>
    %116 = vector.broadcast %1 : vector<1x32xf32> to vector<64x32xf32>
    %117 = arith.addf %115, %116 : vector<64x32xf32>
    %cst_77 = arith.constant 0.000000e+00 : f32
    %118 = vector.broadcast %cst_77 : f32 to vector<64x32xf32>
    %119 = arith.maximumf %117, %118 : vector<64x32xf32>
    %120 = arith.maximumf %112, %119 : vector<64x32xf32>
    %c0_78 = arith.constant 0 : index
    %c15 = arith.constant 15 : index
    %c0_79 = arith.constant 0 : index
    %c0_80 = arith.constant 0 : index
    %121 = vector.load %arg2[%c0_78, %c15, %c0_79, %c0_80] : memref<1x16x64x35xbf16, #tpu.memory_space<vmem>>, vector<1x1x64x35xbf16>
    %122 = vector.shape_cast %121 : vector<1x1x64x35xbf16> to vector<64x35xbf16>
    %cst_81 = arith.constant dense<0.000000e+00> : vector<64x32xf32>
    %123 = tpu.matmul %122, %0, %cst_81 {dimension_numbers = #tpu.dot_dimension_numbers<[1], [0], [0], [1], [0, 0, 1, 1], [], []>} : vector<64x35xbf16>, vector<35x32xbf16>, vector<64x32xf32> -> vector<64x32xf32>
    %124 = vector.broadcast %1 : vector<1x32xf32> to vector<64x32xf32>
    %125 = arith.addf %123, %124 : vector<64x32xf32>
    %cst_82 = arith.constant 0.000000e+00 : f32
    %126 = vector.broadcast %cst_82 : f32 to vector<64x32xf32>
    %127 = arith.maximumf %125, %126 : vector<64x32xf32>
    %128 = arith.maximumf %120, %127 : vector<64x32xf32>
    %129 = arith.truncf %128 : vector<64x32xf32> to vector<64x32xbf16>
    %c0_83 = arith.constant 0 : index
    %c0_84 = arith.constant 0 : index
    %130 = vector.load %arg6[%c0_83, %c0_84] : memref<32x128xbf16, #tpu.memory_space<vmem>>, vector<32x128xbf16>
    %cst_85 = arith.constant dense<0.000000e+00> : vector<64x128xf32>
    %131 = tpu.matmul %129, %130, %cst_85 {dimension_numbers = #tpu.dot_dimension_numbers<[1], [0], [0], [1], [0, 0, 1, 1], [], []>} : vector<64x32xbf16>, vector<32x128xbf16>, vector<64x128xf32> -> vector<64x128xf32>
    %c0_86 = arith.constant 0 : index
    %c0_87 = arith.constant 0 : index
    %132 = vector.load %arg7[%c0_86, %c0_87] : memref<1x128xf32, #tpu.memory_space<vmem>>, vector<1x128xf32>
    %133 = vector.broadcast %132 : vector<1x128xf32> to vector<64x128xf32>
    %134 = arith.addf %131, %133 : vector<64x128xf32>
    %cst_88 = arith.constant 0.000000e+00 : f32
    %135 = vector.broadcast %cst_88 : f32 to vector<64x128xf32>
    %136 = arith.maximumf %134, %135 : vector<64x128xf32>
    %137 = arith.truncf %136 : vector<64x128xf32> to vector<64x128xbf16>
    %c0_89 = arith.constant 0 : index
    %c0_90 = arith.constant 0 : index
    %138 = vector.load %arg8[%c0_89, %c0_90] : memref<128x32xbf16, #tpu.memory_space<vmem>>, vector<128x32xbf16>
    %cst_91 = arith.constant dense<0.000000e+00> : vector<64x32xf32>
    %139 = tpu.matmul %137, %138, %cst_91 {dimension_numbers = #tpu.dot_dimension_numbers<[1], [0], [0], [1], [0, 0, 1, 1], [], []>} : vector<64x128xbf16>, vector<128x32xbf16>, vector<64x32xf32> -> vector<64x32xf32>
    %c0_92 = arith.constant 0 : index
    %c0_93 = arith.constant 0 : index
    %140 = vector.load %arg9[%c0_92, %c0_93] : memref<1x32xf32, #tpu.memory_space<vmem>>, vector<1x32xf32>
    %141 = vector.broadcast %140 : vector<1x32xf32> to vector<64x32xf32>
    %142 = arith.addf %139, %141 : vector<64x32xf32>
    %c0_94 = arith.constant 0 : index
    %c0_95 = arith.constant 0 : index
    %c0_96 = arith.constant 0 : index
    %143 = vector.load %arg3[%c0_94, %c0_95, %c0_96] : memref<1x64x32xf32, #tpu.memory_space<vmem>>, vector<1x64x32xf32>
    %144 = vector.shape_cast %143 : vector<1x64x32xf32> to vector<64x32xf32>
    %145 = arith.addf %142, %144 : vector<64x32xf32>
    %cst_97 = arith.constant 0.000000e+00 : f32
    %146 = vector.broadcast %cst_97 : f32 to vector<64x32xf32>
    %147 = arith.maximumf %145, %146 : vector<64x32xf32>
    %c0_98 = arith.constant 0 : index
    %c0_99 = arith.constant 0 : index
    %c0_100 = arith.constant 0 : index
    %148 = vector.load %arg10[%c0_98, %c0_99, %c0_100] : memref<1x64x32xf32, #tpu.memory_space<vmem>>, vector<1x64x32xf32>
    %149 = vector.shape_cast %148 : vector<1x64x32xf32> to vector<64x32xf32>
    %150 = vector.shape_cast %147 : vector<64x32xf32> to vector<1x64x32xf32>
    tpu.vector_store %arg10[%c0_98, %c0_99, %c0_100], %150 {strides = array<i32>} : memref<1x64x32xf32, #tpu.memory_space<vmem>>, vector<1x64x32xf32>,
    return
  }
  func.func @transform_0(%arg0: i32, %arg1: i32) -> (i32, i32, i32, i32) {
    %c0_i32 = arith.constant 0 : i32
    %c0_i32_0 = arith.constant 0 : i32
    %c0_i32_1 = arith.constant 0 : i32
    return %arg0, %c0_i32, %arg1, %c0_i32_0 : i32, i32, i32, i32
  }
  func.func @transform_1(%arg0: i32, %arg1: i32) -> (i32, i32, i32) {
    %c0_i32 = arith.constant 0 : i32
    %c0_i32_0 = arith.constant 0 : i32
    return %arg0, %arg1, %c0_i32 : i32, i32, i32
  }
  func.func @transform_2(%arg0: i32, %arg1: i32) -> (i32, i32) {
    %c0_i32 = arith.constant 0 : i32
    %c0_i32_0 = arith.constant 0 : i32
    %c0_i32_1 = arith.constant 0 : i32
    return %c0_i32, %c0_i32_0 : i32, i32
  }
  func.func @transform_3(%arg0: i32, %arg1: i32) -> (i32, i32) {
    %c0_i32 = arith.constant 0 : i32
    %c0_i32_0 = arith.constant 0 : i32
    %c0_i32_1 = arith.constant 0 : i32
    return %c0_i32, %c0_i32_0 : i32, i32
  }
  func.func @transform_4(%arg0: i32, %arg1: i32) -> (i32, i32) {
    %c0_i32 = arith.constant 0 : i32
    %c0_i32_0 = arith.constant 0 : i32
    %c0_i32_1 = arith.constant 0 : i32
    return %c0_i32, %c0_i32_0 : i32, i32
  }
  func.func @transform_5(%arg0: i32, %arg1: i32) -> (i32, i32) {
    %c0_i32 = arith.constant 0 : i32
    %c0_i32_0 = arith.constant 0 : i32
    %c0_i32_1 = arith.constant 0 : i32
    return %c0_i32, %c0_i32_0 : i32, i32
  }
  func.func @transform_6(%arg0: i32, %arg1: i32) -> (i32, i32) {
    %c0_i32 = arith.constant 0 : i32
    %c0_i32_0 = arith.constant 0 : i32
    %c0_i32_1 = arith.constant 0 : i32
    return %c0_i32, %c0_i32_0 : i32, i32
  }
  func.func @transform_7(%arg0: i32, %arg1: i32) -> (i32, i32) {
    %c0_i32 = arith.constant 0 : i32
    %c0_i32_0 = arith.constant 0 : i32
    %c0_i32_1 = arith.constant 0 : i32
    return %c0_i32, %c0_i32_0 : i32, i32
  }
  func.func @transform_8(%arg0: i32, %arg1: i32) -> (i32, i32, i32) {
    %c0_i32 = arith.constant 0 : i32
    %c0_i32_0 = arith.constant 0 : i32
    return %arg0, %arg1, %c0_i32 : i32, i32, i32
  }
}

</mosaic_0001>

<bundles_post_ra>
// kernel: tpu_custom_call.1
= control target key start
LH: loop header
LB: loop body
LE: loop exit
PB: predicated region body
PF: predicated region fallthrough
CT: control target
= control target key end

     0   :  { %s2782_s27 = smov 0   ;;  %s2784_s28 = smov 0   ;;  %s3371_s0 = inlined_call_operand.vmem [shape: bf16[2,16,64,35], index: 0, kind: input, shape index: {}]   ;;  %s3372_s1 = inlined_call_operand.vmem [shape: f32[2,64,32], index: 1, kind: input, shape index: {}]   ;;  %s3373_s2 = inlined_call_operand.vmem [shape: bf16[35,32], index: 2, kind: input, shape index: {}]   ;;  %s3374_s3 = inlined_call_operand.vmem [shape: f32[1,32], index: 3, kind: input, shape index: {}]   ;;  %s3375_s4 = inlined_call_operand.vmem [shape: bf16[32,128], index: 4, kind: input, shape index: {}]   ;;  %s3376_s5 = inlined_call_operand.vmem [shape: f32[1,128], index: 5, kind: input, shape index: {}]   ;;  %s3377_s6 = inlined_call_operand.vmem [shape: bf16[128,32], index: 6, kind: input, shape index: {}]   ;;  %s3378_s7 = inlined_call_operand.vmem [shape: f32[1,32], index: 7, kind: input, shape index: {}]   ;;  %s3379_s8 = inlined_call_operand.vmem [shape: f32[2,64,32], index: 8, kind: output, shape index: {}]  }
   0x1   :  { %s2786_s29 = smov 0  }
   0x2 LB: > { %s30_s30 = sadd.s32 1, %s2730_s28  ;;  %p2097_p0 = scmp.ge.s32.totalorder %s2734_s29, 1  ;;  %s2734_s29 = sphi %s2786_s29, %s18_s29   ;;  %s2730_s28 = sphi %s2784_s28, %s3381_s28   ;;  %s2726_s27 = sphi %s2782_s27, %s3380_s27  }
   0x3   : > { %p32_p1 = scmp.ge.s32.totalorder %s30_s30, 2  ;;  %p300_p2 = scmp.lt.s32.totalorder %s2734_s29, 3 }
   0x5   : > { %s3383_s30 = smov (%p32_p1, %s30_s30), 0  ;;  %p301_p3 = pnand %p2097_p0, %p300_p2 }
   0x6   : > { %p352_p4 = scmp.lt.s32.totalorder (!%p301_p3), %s2726_s27, 1 }
   0x7   : > { %304 = sbr.rel (%p301_p3) target bundleno = 733 (0x2dd), region = 52 }
   0xc   : > { %v386_v0 = vld [vmem:[%s3373_s2 + $0x10] sm:$0x3]  ;;  %vm447_vm0 = vcmask 1040384   ;;  %vm448_vm1 = vcmask 1041408   ;;  %v2736_v2 = vmov 65535   ;;  %s3385_s27 = smov (!%p352_p4, %s2726_s27), 1 }
   0xd   : > { %v428_v1 = vunpack.c.l.b16 %v386_v0  ;;  %v449_v3 = vsel %vm447_vm0, 4294967295, %v2736_v2  ;;  %v2812_v7 = vld [vmem:[%s3373_s2 + $0x8] sm:$0xff]  ;;  %s2598_s13 = sshll.u32 %s3385_s27, 9  ;;  %v2822_v8 = vld [vmem:[%s3373_s2] sm:$0xff]  ;;  %vm434_vm2 = vcmask 285696   ;;  %vm1805_vm3 = vcmask 261120  }
   0xe   : > { %v450_v4 = vsel %vm448_vm1, %v449_v3, 0  ;;  %s2827_s18 = scalar_lea.vmem %s3371_s0, %s2598_s13  ;;  %v2946_v43 = vld [vmem:[%s3374_s3] ss:$0 sm:$0xff]  ;;  %s2599_s9 = sshll.u32 %s3385_s27, 6 }
   0xf   : > { %v431_v5 = vpack.c.b16 %v428_v1, %v428_v1  ;;  %v2605_v9 = vld [vmem:[%s2827_s18 + $0x10] sm:$0xff]  ;;  %v2603_v11 = vld [vmem:[%s2827_s18] sm:$0xff]  ;;  %v2606_v13 = vld [vmem:[%s2827_s18 + $0x18] sm:$0xff]  ;;  %s3328_s12 = scalar_lea.vmem %s3372_s1, %s2599_s9  ;;  %s3337_s27 = scalar_lea.vmem %s3379_s8, %s2599_s9 }
  0x10   : > { %v2609_v10 = vld [vmem:[%s2827_s18 + $0x30] sm:$0xff]  ;;  %v2607_v12 = vld [vmem:[%s2827_s18 + $0x20] sm:$0xff]  ;;  %v2610_v14 = vld [vmem:[%s2827_s18 + $0x38] sm:$0xff] }
  0x11   : > { %v2805_v6 = vand.u32 %v450_v4, %v431_v5  ;;  %v2604_v15 = vld [vmem:[%s2827_s18 + $0x8] sm:$0xff]  ;;  %v2611_v17 = vld [vmem:[%s2827_s18 + $0x40] sm:$0xff]  ;;  %v2613_v25 = vld [vmem:[%s2827_s18 + $0x50] sm:$0xff] }
  0x12   : > { %v2608_v16 = vld [vmem:[%s2827_s18 + $0x28] sm:$0xff]  ;;  %v2615_v18 = vld [vmem:[%s2827_s18 + $0x60] sm:$0xff]  ;;  %v2617_v26 = vld [vmem:[%s2827_s18 + $0x70] sm:$0xff] }
  0x13   : > { %2677 = vmatpush.bf16.msra.mxu2 %v2805_v6  ;;  %2680 = vmatpush.bf16.msra.mxu3 %v2805_v6  ;;  %v2619_v19 = vld [vmem:[%s2827_s18 + $0x80] sm:$0xff]  ;;  %v2612_v21 = vld [vmem:[%s2827_s18 + $0x48] sm:$0xff]  ;;  %v2621_v27 = vld [vmem:[%s2827_s18 + $0x90] sm:$0xff] }
  0x14   : > { %459 = vmatpush.bf16.msra.mxu0 %v2805_v6  ;;  %537 = vmatpush.bf16.msra.mxu1 %v2805_v6  ;;  %v2623_v20 = vld [vmem:[%s2827_s18 + $0xa0] sm:$0xff]  ;;  %v2616_v22 = vld [vmem:[%s2827_s18 + $0x68] sm:$0xff]  ;;  %v2625_v28 = vld [vmem:[%s2827_s18 + $0xb0] sm:$0xff] }
  0x15   : > { %v2620_v23 = vld [vmem:[%s2827_s18 + $0x88] sm:$0xff]  ;;  %v2614_v29 = vld [vmem:[%s2827_s18 + $0x58] sm:$0xff]  ;;  %v2627_v33 = vld [vmem:[%s2827_s18 + $0xc0] sm:$0xff] }
  0x16   : > { %v2624_v24 = vld [vmem:[%s2827_s18 + $0xa8] sm:$0xff]  ;;  %v2618_v30 = vld [vmem:[%s2827_s18 + $0x78] sm:$0xff]  ;;  %v2631_v34 = vld [vmem:[%s2827_s18 + $0xe0] sm:$0xff] }
  0x17   : > { %2678 = vmatpush.bf16.msra.mxu2 %v2812_v7  ;;  %2681 = vmatpush.bf16.msra.mxu3 %v2812_v7  ;;  %v2622_v31 = vld [vmem:[%s2827_s18 + $0x98] sm:$0xff]  ;;  %v2635_v35 = vld [vmem:[%s2827_s18 + $0x100] sm:$0xff]  ;;  %v2628_v37 = vld [vmem:[%s2827_s18 + $0xc8] sm:$0xff] }
  0x18   : > { %460 = vmatpush.bf16.msra.mxu0 %v2812_v7  ;;  %538 = vmatpush.bf16.msra.mxu1 %v2812_v7  ;;  %v2626_v32 = vld [vmem:[%s2827_s18 + $0xb8] sm:$0xff]  ;;  %v2639_v36 = vld [vmem:[%s2827_s18 + $0x120] sm:$0xff]  ;;  %v2632_v38 = vld [vmem:[%s2827_s18 + $0xe8] sm:$0xff] }
  0x19   : > { %v2636_v39 = vld [vmem:[%s2827_s18 + $0x108] sm:$0xff]  ;;  %v2629_v41 = vld [vmem:[%s2827_s18 + $0xd0] sm:$0xff] }
  0x1a   : > { %v2640_v40 = vld [vmem:[%s2827_s18 + $0x128] sm:$0xff]  ;;  %v2633_v42 = vld [vmem:[%s2827_s18 + $0xf0] sm:$0xff] }
  0x1b   : > { %2679 = vmatpush.bf16.msra.mxu2 %v2822_v8  ;;  %2682 = vmatpush.bf16.msra.mxu3 %v2822_v8  ;;  %v2637_v44 = vld [vmem:[%s2827_s18 + $0x110] sm:$0xff] }
  0x1c   : > { %461 = vmatpush.bf16.msra.mxu0 %v2822_v8  ;;  %539 = vmatpush.bf16.msra.mxu1 %v2822_v8  ;;  %v2641_v46 = vld [vmem:[%s2827_s18 + $0x130] sm:$0xff] }
  0x1e   : > { %2130 = vmatmul.msk.bf16.vlgmr.msra.gmra.mxu2 %vm434_vm2, %v2605_v9  ;;  %2158 = vmatmul.msk.bf16.vlgmr.msra.gmra.mxu3 %vm434_vm2, %v2609_v10 }
  0x1f   : > { %623 = vmatpush.bf16.msrb.mxu2 %v2805_v6  ;;  %709 = vmatpush.bf16.msrb.mxu3 %v2805_v6 }
  0x20   : > { %795 = vmatpush.bf16.msrb.mxu0 %v2805_v6  ;;  %881 = vmatpush.bf16.msrb.mxu1 %v2805_v6 }
  0x21   : > { %2128 = vmatmul.msk.bf16.vlgmr.msra.gmra.mxu0 %vm434_vm2, %v2603_v11  ;;  %2156 = vmatmul.msk.bf16.vlgmr.msra.gmra.mxu1 %vm434_vm2, %v2607_v12  ;;  %v2638_v11 = vld [vmem:[%s2827_s18 + $0x118] sm:$0xff] }
  0x23   : > { %624 = vmatpush.bf16.msrb.mxu2 %v2812_v7  ;;  %710 = vmatpush.bf16.msrb.mxu3 %v2812_v7 }
  0x24   : > { %796 = vmatpush.bf16.msrb.mxu0 %v2812_v7  ;;  %882 = vmatpush.bf16.msrb.mxu1 %v2812_v7 }
  0x27   : > { %625 = vmatpush.bf16.msrb.mxu2 %v2822_v8  ;;  %711 = vmatpush.bf16.msrb.mxu3 %v2822_v8 }
  0x28   : > { %797 = vmatpush.bf16.msrb.mxu0 %v2822_v8  ;;  %883 = vmatpush.bf16.msrb.mxu1 %v2822_v8 }
  0x2b   : > { %967 = vmatpush.bf16.msra.mxu2 %v2805_v6  ;;  %1053 = vmatpush.bf16.msra.mxu3 %v2805_v6 }
  0x2c   : > { %1139 = vmatpush.bf16.msra.mxu0 %v2805_v6  ;;  %1225 = vmatpush.bf16.msra.mxu1 %v2805_v6 }
  0x2e   : > { %2131 = vmatmul.msk.bf16.gmra.mxu2 %vm434_vm2, %v2606_v13  ;;  %2159 = vmatmul.msk.bf16.gmra.mxu3 %vm434_vm2, %v2610_v14  ;;  %v2642_v13 = vld [vmem:[%s2827_s18 + $0x138] sm:$0xff] }
  0x2f   : > { %968 = vmatpush.bf16.msra.mxu2 %v2812_v7  ;;  %1054 = vmatpush.bf16.msra.mxu3 %v2812_v7 }
  0x30   : > { %1140 = vmatpush.bf16.msra.mxu0 %v2812_v7  ;;  %1226 = vmatpush.bf16.msra.mxu1 %v2812_v7 }
  0x31   : > { %2129 = vmatmul.msk.bf16.gmra.mxu0 %vm434_vm2, %v2604_v15  ;;  %2157 = vmatmul.msk.bf16.gmra.mxu1 %vm434_vm2, %v2608_v16 }
  0x33   : > { %969 = vmatpush.bf16.msra.mxu2 %v2822_v8  ;;  %1055 = vmatpush.bf16.msra.mxu3 %v2822_v8 }
  0x34   : > { %1227 = vmatpush.bf16.msra.mxu1 %v2822_v8  ;;  %1141 = vmatpush.bf16.msra.mxu0 %v2822_v8 }
  0x3e   : > { %2184 = vmatmul.msk.bf16.vlgmr.msrb.gmra.mxu2 %vm434_vm2, %v2611_v17  ;;  %2212 = vmatmul.msk.bf16.vlgmr.msrb.gmra.mxu3 %vm434_vm2, %v2615_v18 }
  0x3f   : > { %1311 = vmatpush.bf16.msrb.mxu2 %v2805_v6  ;;  %1397 = vmatpush.bf16.msrb.mxu3 %v2805_v6 }
  0x41   : > { %2240 = vmatmul.msk.bf16.vlgmr.msrb.gmra.mxu0 %vm434_vm2, %v2619_v19  ;;  %2268 = vmatmul.msk.bf16.vlgmr.msrb.gmra.mxu1 %vm434_vm2, %v2623_v20 }
  0x42   : > { %1483 = vmatpush.bf16.msrb.mxu0 %v2805_v6  ;;  %1569 = vmatpush.bf16.msrb.mxu1 %v2805_v6 }
  0x43   : > { %1312 = vmatpush.bf16.msrb.mxu2 %v2812_v7  ;;  %1398 = vmatpush.bf16.msrb.mxu3 %v2812_v7 }
  0x46   : > { %1484 = vmatpush.bf16.msrb.mxu0 %v2812_v7  ;;  %1570 = vmatpush.bf16.msrb.mxu1 %v2812_v7 }
  0x47   : > { %1313 = vmatpush.bf16.msrb.mxu2 %v2822_v8  ;;  %1399 = vmatpush.bf16.msrb.mxu3 %v2822_v8 }
  0x4a   : > { %1485 = vmatpush.bf16.msrb.mxu0 %v2822_v8  ;;  %1571 = vmatpush.bf16.msrb.mxu1 %v2822_v8 }
  0x4e   : > { %2185 = vmatmul.msk.bf16.gmra.mxu2 %vm434_vm2, %v2612_v21  ;;  %2213 = vmatmul.msk.bf16.gmra.mxu3 %vm434_vm2, %v2616_v22 }
  0x51   : > { %2241 = vmatmul.msk.bf16.gmra.mxu0 %vm434_vm2, %v2620_v23  ;;  %2269 = vmatmul.msk.bf16.gmra.mxu1 %vm434_vm2, %v2624_v24 }
  0x5e   : > { %2186 = vmatmul.msk.bf16.gmra.mxu2 %vm434_vm2, %v2613_v25  ;;  %2214 = vmatmul.msk.bf16.gmra.mxu3 %vm434_vm2, %v2617_v26 }
  0x61   : > { %2242 = vmatmul.msk.bf16.gmra.mxu0 %vm434_vm2, %v2621_v27  ;;  %2270 = vmatmul.msk.bf16.gmra.mxu1 %vm434_vm2, %v2625_v28 }
  0x6e   : > { %2187 = vmatmul.msk.bf16.gmra.mxu2 %vm434_vm2, %v2614_v29  ;;  %2215 = vmatmul.msk.bf16.gmra.mxu3 %vm434_vm2, %v2618_v30 }
  0x71   : > { %2243 = vmatmul.msk.bf16.gmra.mxu0 %vm434_vm2, %v2622_v31  ;;  %2271 = vmatmul.msk.bf16.gmra.mxu1 %vm434_vm2, %v2626_v32 }
  0x7e   : > { %2296 = vmatmul.msk.bf16.vlgmr.msra.gmra.mxu2 %vm434_vm2, %v2627_v33  ;;  %2324 = vmatmul.msk.bf16.vlgmr.msra.gmra.mxu3 %vm434_vm2, %v2631_v34 }
  0x7f   : > { %1655 = vmatpush.bf16.msra.mxu2 %v2805_v6  ;;  %1741 = vmatpush.bf16.msra.mxu3 %v2805_v6  ;;  %v2630_v6 = vld [vmem:[%s2827_s18 + $0xd8] sm:$0xff] }
  0x81   : > { %2352 = vmatmul.msk.bf16.vlgmr.msra.gmra.mxu0 %vm434_vm2, %v2635_v35  ;;  %2380 = vmatmul.msk.bf16.vlgmr.msra.gmra.mxu1 %vm434_vm2, %v2639_v36 }
  0x83   : > { %1656 = vmatpush.bf16.msra.mxu2 %v2812_v7  ;;  %1742 = vmatpush.bf16.msra.mxu3 %v2812_v7  ;;  %v2634_v7 = vld [vmem:[%s2827_s18 + $0xf8] sm:$0xff] }
  0x87   : > { %1657 = vmatpush.bf16.msra.mxu2 %v2822_v8  ;;  %1743 = vmatpush.bf16.msra.mxu3 %v2822_v8 }
  0x8e   : > { %2297 = vmatmul.msk.bf16.gmra.mxu2 %vm434_vm2, %v2628_v37  ;;  %2325 = vmatmul.msk.bf16.gmra.mxu3 %vm434_vm2, %v2632_v38  ;;  %v2643_v38 = vld [vmem:[%s2827_s18 + $0x140] sm:$0xff] }
  0x91   : > { %2353 = vmatmul.msk.bf16.gmra.mxu0 %vm434_vm2, %v2636_v39  ;;  %2381 = vmatmul.msk.bf16.gmra.mxu1 %vm434_vm2, %v2640_v40  ;;  %v2647_v39 = vld [vmem:[%s2827_s18 + $0x160] sm:$0xff] }
  0x9e   : > { %v463_v45 = vpop.f32.mrf.mxu0  ;;  %2298 = vmatmul.msk.bf16.gmra.mxu2 %vm434_vm2, %v2629_v41  ;;  %2326 = vmatmul.msk.bf16.gmra.mxu3 %vm434_vm2, %v2633_v42  ;;  %v541_v48 = vpop.f32.mrf.mxu1 }
  0x9f   : > { %v464_v47 = vadd.f32 %v2946_v43, %v463_v45  ;;  %v542_v49 = vadd.f32 %v2946_v43, %v541_v48 }
  0xa1   : > { %v483_v50 = vmax.f32 %v464_v47, 0.0  ;;  %2354 = vmatmul.msk.bf16.gmra.mxu0 %vm434_vm2, %v2637_v44  ;;  %v473_v51 = vpop.f32.mrf.mxu2  ;;  %v551_v52 = vpop.f32.mrf.mxu3  ;;  %v561_v53 = vmax.f32 %v542_v49, 0.0  ;;  %2382 = vmatmul.msk.bf16.gmra.mxu1 %vm434_vm2, %v2641_v46  ;;  %v2651_v44 = vld [vmem:[%s2827_s18 + $0x180] sm:$0xff] }
  0xa2   : > { %v474_v54 = vadd.f32 %v2946_v43, %v473_v51  ;;  %v552_v55 = vadd.f32 %v2946_v43, %v551_v52  ;;  %v2655_v46 = vld [vmem:[%s2827_s18 + $0x1a0] sm:$0xff] }
  0xa3   : > { %v2958_v56 = vmax.f32 %v483_v50, %v561_v53 }
  0xa4   : > { %v487_v57 = vmax.f32 %v474_v54, 0.0  ;;  %v565_v58 = vmax.f32 %v552_v55, 0.0 }
  0xa6   : > { %v465_v59 = vpop.f32.mrf.mxu0  ;;  %v2960_v60 = vmax.f32 %v487_v57, %v565_v58  ;;  %v543_v62 = vpop.f32.mrf.mxu1 }
  0xa7   : > { %v466_v61 = vadd.f32 %v2946_v43, %v465_v59  ;;  %v544_v63 = vadd.f32 %v2946_v43, %v543_v62 }
  0xa9   : > { %v484_v0 = vmax.f32 %v466_v61, 0.0  ;;  %v475_v1 = vpop.f32.mrf.mxu2  ;;  %v553_v2 = vpop.f32.mrf.mxu3  ;;  %v562_v3 = vmax.f32 %v544_v63, 0.0 }
  0xaa   : > { %v476_v4 = vadd.f32 %v2946_v43, %v475_v1  ;;  %v554_v5 = vadd.f32 %v2946_v43, %v553_v2 }
  0xab   : > { %v2968_v8 = vmax.f32 %v484_v0, %v562_v3 }
  0xac   : > { %v488_v9 = vmax.f32 %v476_v4, 0.0  ;;  %v566_v10 = vmax.f32 %v554_v5, 0.0 }
  0xae   : > { %v468_v12 = vpop.f32.mrf.mxu0  ;;  %v2972_v14 = vmax.f32 %v488_v9, %v566_v10  ;;  %2299 = vmatmul.msk.bf16.gmra.mxu2 %vm434_vm2, %v2630_v6  ;;  %2327 = vmatmul.msk.bf16.gmra.mxu3 %vm434_vm2, %v2634_v7  ;;  %v546_v16 = vpop.f32.mrf.mxu1  ;;  %v2644_v6 = vld [vmem:[%s2827_s18 + $0x148] sm:$0xff] }
  0xaf   : > { %v469_v15 = vadd.f32 %v2946_v43, %v468_v12  ;;  %v547_v17 = vadd.f32 %v2946_v43, %v546_v16  ;;  %v2648_v7 = vld [vmem:[%s2827_s18 + $0x168] sm:$0xff] }
  0xb0   : > { %v2656_v12 = vld [vmem:[%s2827_s18 + $0x1a8] sm:$0xff] }
  0xb1   : > { %v485_v18 = vmax.f32 %v469_v15, 0.0  ;;  %2355 = vmatmul.msk.bf16.gmra.mxu0 %vm434_vm2, %v2638_v11  ;;  %v478_v19 = vpop.f32.mrf.mxu2  ;;  %v556_v20 = vpop.f32.mrf.mxu3  ;;  %v563_v21 = vmax.f32 %v547_v17, 0.0  ;;  %2383 = vmatmul.msk.bf16.gmra.mxu1 %vm434_vm2, %v2642_v13  ;;  %v2652_v11 = vld [vmem:[%s2827_s18 + $0x188] sm:$0xff] }
  0xb2   : > { %v479_v22 = vadd.f32 %v2946_v43, %v478_v19  ;;  %v557_v23 = vadd.f32 %v2946_v43, %v556_v20 }
  0xb3   : > { %v2982_v24 = vmax.f32 %v485_v18, %v563_v21 }
  0xb4   : > { %v489_v25 = vmax.f32 %v479_v22, 0.0  ;;  %v567_v26 = vmax.f32 %v557_v23, 0.0 }
  0xb6   : > { %v470_v27 = vpop.f32.mrf.mxu0  ;;  %v2984_v28 = vmax.f32 %v489_v25, %v567_v26  ;;  %v548_v30 = vpop.f32.mrf.mxu1 }
  0xb7   : > { %v471_v29 = vadd.f32 %v2946_v43, %v470_v27  ;;  %v549_v31 = vadd.f32 %v2946_v43, %v548_v30 }
  0xb9   : > { %v486_v32 = vmax.f32 %v471_v29, 0.0  ;;  %v480_v33 = vpop.f32.mrf.mxu2  ;;  %v558_v34 = vpop.f32.mrf.mxu3  ;;  %v564_v35 = vmax.f32 %v549_v31, 0.0 }
  0xba   : > { %v481_v36 = vadd.f32 %v2946_v43, %v480_v33  ;;  %v559_v37 = vadd.f32 %v2946_v43, %v558_v34 }
  0xbb   : > { %v2992_v40 = vmax.f32 %v486_v32, %v564_v35 }
  0xbc   : > { %v490_v41 = vmax.f32 %v481_v36, 0.0  ;;  %v568_v42 = vmax.f32 %v559_v37, 0.0 }
  0xbe   : > { %v799_v45 = vpop.f32.mrf.mxu0  ;;  %v2996_v47 = vmax.f32 %v490_v41, %v568_v42  ;;  %2408 = vmatmul.msk.bf16.vlgmr.msrb.gmra.mxu2 %vm434_vm2, %v2643_v38  ;;  %2436 = vmatmul.msk.bf16.vlgmr.msrb.gmra.mxu3 %vm434_vm2, %v2647_v39  ;;  %v885_v48 = vpop.f32.mrf.mxu1  ;;  %v2645_v38 = vld [vmem:[%s2827_s18 + $0x150] sm:$0xff] }
  0xbf   : > { %v800_v53 = vadd.f32 %v2946_v43, %v799_v45  ;;  %v886_v57 = vadd.f32 %v2946_v43, %v885_v48  ;;  %v2649_v39 = vld [vmem:[%s2827_s18 + $0x170] sm:$0xff] }
  0xc0   : > { %v2657_v45 = vld [vmem:[%s2827_s18 + $0x1b0] sm:$0xff] }
  0xc1   : > { %2464 = vmatmul.msk.bf16.vlgmr.msrb.gmra.mxu0 %vm434_vm2, %v2651_v44  ;;  %v627_v49 = vpop.f32.mrf.mxu2  ;;  %v713_v50 = vpop.f32.mrf.mxu3  ;;  %2492 = vmatmul.msk.bf16.vlgmr.msrb.gmra.mxu1 %vm434_vm2, %v2655_v46  ;;  %v819_v61 = vmax.f32 %v800_v53, 0.0  ;;  %v905_v0 = vmax.f32 %v886_v57, 0.0  ;;  %v2653_v44 = vld [vmem:[%s2827_s18 + $0x190] sm:$0xff] }
  0xc2   : > { %v628_v51 = vadd.f32 %v2946_v43, %v627_v49  ;;  %v714_v52 = vadd.f32 %v2946_v43, %v713_v50 }
  0xc4   : > { %v647_v54 = vmax.f32 %v628_v51, 0.0  ;;  %v733_v55 = vmax.f32 %v714_v52, 0.0 }
  0xc6   : > { %v3006_v58 = vpop.f32.mrf.mxu0  ;;  %v655_v59 = vmax.f32 %v2958_v56, %v647_v54  ;;  %v3009_v62 = vpop.f32.mrf.mxu1 }
  0xc8   : > { %v741_v63 = vmax.f32 %v655_v59, %v733_v55 }
  0xc9   : > { %v629_v1 = vpop.f32.mrf.mxu2  ;;  %v715_v2 = vpop.f32.mrf.mxu3 }
  0xca   : > { %v827_v3 = vmax.f32 %v741_v63, %v819_v61  ;;  %v630_v4 = vadd.f32 %v2946_v43, %v629_v1  ;;  %v716_v5 = vadd.f32 %v2946_v43, %v715_v2 }
  0xcc   : > { %v3015_v9 = vmax.f32 %v827_v3, %v905_v0  ;;  %v648_v10 = vmax.f32 %v630_v4, 0.0  ;;  %v734_v15 = vmax.f32 %v716_v5, 0.0 }
  0xce   : > { %v804_v56 = vpop.f32.mrf.mxu0  ;;  %v656_v13 = vmax.f32 %v2968_v8, %v648_v10  ;;  %2409 = vmatmul.msk.bf16.gmra.mxu2 %vm434_vm2, %v2644_v6  ;;  %2437 = vmatmul.msk.bf16.gmra.mxu3 %vm434_vm2, %v2648_v7  ;;  %v890_v16 = vpop.f32.mrf.mxu1 }
  0xcf   : > { %v805_v8 = vadd.f32 %v2946_v43, %v804_v56  ;;  %v891_v25 = vadd.f32 %v2946_v43, %v890_v16  ;;  %v2650_v56 = vld [vmem:[%s2827_s18 + $0x178] sm:$0xff] }
  0xd0   : > { %v3022_v17 = vmax.f32 %v656_v13, %v734_v15  ;;  %v2654_v15 = vld [vmem:[%s2827_s18 + $0x198] sm:$0xff] }
  0xd1   : > { %2465 = vmatmul.msk.bf16.gmra.mxu0 %vm434_vm2, %v2652_v11  ;;  %v632_v18 = vpop.f32.mrf.mxu2  ;;  %v718_v19 = vpop.f32.mrf.mxu3  ;;  %2493 = vmatmul.msk.bf16.gmra.mxu1 %vm434_vm2, %v2656_v12  ;;  %v821_v29 = vmax.f32 %v805_v8, 0.0  ;;  %v907_v32 = vmax.f32 %v891_v25, 0.0  ;;  %v2646_v11 = vld [vmem:[%s2827_s18 + $0x158] sm:$0xff] }
  0xd2   : > { %v633_v20 = vadd.f32 %v2946_v43, %v632_v18  ;;  %v719_v21 = vadd.f32 %v2946_v43, %v718_v19  ;;  %v2658_v16 = vld [vmem:[%s2827_s18 + $0x1b8] sm:$0xff] }
  0xd4   : > { %v649_v22 = vmax.f32 %v633_v20, 0.0  ;;  %v735_v23 = vmax.f32 %v719_v21, 0.0 }
  0xd6   : > { %v3030_v26 = vpop.f32.mrf.mxu0  ;;  %v657_v27 = vmax.f32 %v2982_v24, %v649_v22  ;;  %v3033_v30 = vpop.f32.mrf.mxu1 }
  0xd8   : > { %v743_v31 = vmax.f32 %v657_v27, %v735_v23 }
  0xd9   : > { %v634_v33 = vpop.f32.mrf.mxu2  ;;  %v720_v34 = vpop.f32.mrf.mxu3 }
  0xda   : > { %v829_v35 = vmax.f32 %v743_v31, %v821_v29  ;;  %v635_v36 = vadd.f32 %v2946_v43, %v634_v33  ;;  %v721_v37 = vadd.f32 %v2946_v43, %v720_v34 }
  0xdc   : > { %v3039_v41 = vmax.f32 %v829_v35, %v907_v32  ;;  %v650_v42 = vmax.f32 %v635_v36, 0.0  ;;  %v736_v48 = vmax.f32 %v721_v37, 0.0 }
  0xde   : > { %v809_v24 = vpop.f32.mrf.mxu0  ;;  %v658_v46 = vmax.f32 %v2992_v40, %v650_v42  ;;  %2410 = vmatmul.msk.bf16.gmra.mxu2 %vm434_vm2, %v2645_v38  ;;  %2438 = vmatmul.msk.bf16.gmra.mxu3 %vm434_vm2, %v2649_v39  ;;  %v895_v49 = vpop.f32.mrf.mxu1 }
  0xdf   : > { %v810_v40 = vadd.f32 %v2946_v43, %v809_v24  ;;  %v896_v59 = vadd.f32 %v2946_v43, %v895_v49 }
  0xe0   : > { %v3046_v50 = vmax.f32 %v658_v46, %v736_v48  ;;  %v2663_v46 = vld [vmem:[%s2827_s18 + $0x1e0] sm:$0xff] }
  0xe1   : > { %2466 = vmatmul.msk.bf16.gmra.mxu0 %vm434_vm2, %v2653_v44  ;;  %v637_v51 = vpop.f32.mrf.mxu2  ;;  %v723_v52 = vpop.f32.mrf.mxu3  ;;  %2494 = vmatmul.msk.bf16.gmra.mxu1 %vm434_vm2, %v2657_v45  ;;  %v823_v0 = vmax.f32 %v810_v40, 0.0  ;;  %v909_v3 = vmax.f32 %v896_v59, 0.0  ;;  %v2659_v45 = vld [vmem:[%s2827_s18 + $0x1c0] sm:$0xff] }
  0xe2   : > { %v638_v53 = vadd.f32 %v2946_v43, %v637_v51  ;;  %v724_v54 = vadd.f32 %v2946_v43, %v723_v52 }
  0xe4   : > { %v651_v55 = vmax.f32 %v638_v53, 0.0  ;;  %v737_v57 = vmax.f32 %v724_v54, 0.0  ;;  %v802_v54 = vadd.f32 %v2946_v43, %v3006_v58 }
  0xe6   : > { %v3054_v61 = vpop.f32.mrf.mxu0  ;;  %v659_v63 = vmax.f32 %v2960_v60, %v651_v55  ;;  %v3057_v1 = vpop.f32.mrf.mxu1 }
  0xe8   : > { %v745_v2 = vmax.f32 %v659_v63, %v737_v57 }
  0xe9   : > { %v639_v4 = vpop.f32.mrf.mxu2  ;;  %v725_v5 = vpop.f32.mrf.mxu3 }
  0xea   : > { %v831_v6 = vmax.f32 %v745_v2, %v823_v0  ;;  %v640_v7 = vadd.f32 %v2946_v43, %v639_v4  ;;  %v726_v10 = vadd.f32 %v2946_v43, %v725_v5  ;;  %v820_v2 = vmax.f32 %v802_v54, 0.0 }
  0xec   : > { %v3063_v12 = vmax.f32 %v831_v6, %v909_v3  ;;  %v652_v13 = vmax.f32 %v640_v7, 0.0  ;;  %v738_v19 = vmax.f32 %v726_v10, 0.0 }
  0xee   : > { %v814_v60 = vpop.f32.mrf.mxu0  ;;  %v660_v18 = vmax.f32 %v2972_v14, %v652_v13  ;;  %2411 = vmatmul.msk.bf16.gmra.mxu2 %vm434_vm2, %v2646_v11  ;;  %2439 = vmatmul.msk.bf16.gmra.mxu3 %vm434_vm2, %v2650_v56  ;;  %v900_v20 = vpop.f32.mrf.mxu1  ;;  %v828_v11 = vmax.f32 %v3022_v17, %v820_v2 }
  0xef   : > { %v815_v14 = vadd.f32 %v2946_v43, %v814_v60  ;;  %v901_v31 = vadd.f32 %v2946_v43, %v900_v20  ;;  %v2660_v20 = vld [vmem:[%s2827_s18 + $0x1c8] sm:$0xff] }
  0xf0   : > { %v3070_v21 = vmax.f32 %v660_v18, %v738_v19 }
  0xf1   : > { %2467 = vmatmul.msk.bf16.gmra.mxu0 %vm434_vm2, %v2654_v15  ;;  %v642_v8 = vpop.f32.mrf.mxu2  ;;  %v728_v22 = vpop.f32.mrf.mxu3  ;;  %2495 = vmatmul.msk.bf16.gmra.mxu1 %vm434_vm2, %v2658_v16  ;;  %v825_v34 = vmax.f32 %v815_v14, 0.0  ;;  %v911_v37 = vmax.f32 %v901_v31, 0.0 }
  0xf2   : > { %v643_v23 = vadd.f32 %v2946_v43, %v642_v8  ;;  %v729_v25 = vadd.f32 %v2946_v43, %v728_v22  ;;  %v2664_v8 = vld [vmem:[%s2827_s18 + $0x1e8] sm:$0xff] }
  0xf4   : > { %v653_v27 = vmax.f32 %v643_v23, 0.0  ;;  %v739_v29 = vmax.f32 %v729_v25, 0.0 }
  0xf6   : > { %v3078_v32 = vpop.f32.mrf.mxu0  ;;  %v661_v33 = vmax.f32 %v2984_v28, %v653_v27  ;;  %v3081_v35 = vpop.f32.mrf.mxu1 }
  0xf8   : > { %v747_v36 = vmax.f32 %v661_v33, %v739_v29  ;;  %v807_v29 = vadd.f32 %v2946_v43, %v3030_v26 }
  0xf9   : > { %v644_v38 = vpop.f32.mrf.mxu2  ;;  %v730_v39 = vpop.f32.mrf.mxu3 }
  0xfa   : > { %v833_v42 = vmax.f32 %v747_v36, %v825_v34  ;;  %v645_v44 = vadd.f32 %v2946_v43, %v644_v38  ;;  %v731_v24 = vadd.f32 %v2946_v43, %v730_v39  ;;  %v893_v39 = vadd.f32 %v2946_v43, %v3033_v30 }
  0xfc   : > { %v3087_v48 = vmax.f32 %v833_v42, %v911_v37  ;;  %v654_v49 = vmax.f32 %v645_v44, 0.0  ;;  %v740_v52 = vmax.f32 %v731_v24, 0.0  ;;  %v822_v42 = vmax.f32 %v807_v29, 0.0 }
  0xfe   : > { %v1143_v51 = vpop.f32.mrf.mxu0  ;;  %v662_v28 = vmax.f32 %v2996_v47, %v654_v49  ;;  %2520 = vmatmul.msk.bf16.vlgmr.msra.gmra.mxu2 %vm434_vm2, %v2659_v45  ;;  %2548 = vmatmul.msk.bf16.vlgmr.msra.gmra.mxu3 %vm434_vm2, %v2663_v46  ;;  %v1229_v53 = vpop.f32.mrf.mxu1  ;;  %v888_v47 = vadd.f32 %v2946_v43, %v3009_v62 }
  0xff   : > { %v1144_v0 = vadd.f32 %v2946_v43, %v1143_v51  ;;  %v1230_v58 = vadd.f32 %v2946_v43, %v1229_v53 }
 0x100   : > { %v3094_v40 = vmax.f32 %v662_v28, %v740_v52  ;;  %v906_v56 = vmax.f32 %v888_v47, 0.0  ;;  %v830_v28 = vmax.f32 %v3046_v50, %v822_v42  ;;  %v908_v52 = vmax.f32 %v893_v39, 0.0  ;;  %v2665_v47 = vld [vmem:[%s2827_s18 + $0x1f0] sm:$0xff]  ;;  %v2666_v39 = vld [vmem:[%s2827_s18 + $0x1f8] sm:$0xff] }
 0x101   : > { %v971_v55 = vpop.f32.mrf.mxu2  ;;  %v1057_v57 = vpop.f32.mrf.mxu3  ;;  %v1163_v7 = vmax.f32 %v1144_v0, 0.0  ;;  %v1249_v15 = vmax.f32 %v1230_v58, 0.0  ;;  %v2661_v0 = vld [vmem:[%s2827_s18 + $0x1d0] sm:$0xff] }
 0x102   : > { %v972_v59 = vadd.f32 %v2946_v43, %v971_v55  ;;  %v1058_v63 = vadd.f32 %v2946_v43, %v1057_v57  ;;  %v914_v22 = vmax.f32 %v828_v11, %v906_v56  ;;  %v916_v2 = vmax.f32 %v830_v28, %v908_v52 }
 0x104   : > { %v991_v3 = vmax.f32 %v972_v59, 0.0  ;;  %v1077_v4 = vmax.f32 %v1058_v63, 0.0 }
 0x106   : > { %v3102_v5 = vpop.f32.mrf.mxu0  ;;  %v999_v6 = vmax.f32 %v3015_v9, %v991_v3  ;;  %v3105_v10 = vpop.f32.mrf.mxu1 }
 0x108   : > { %v1085_v13 = vmax.f32 %v999_v6, %v1077_v4 }
 0x109   : > { %v973_v62 = vpop.f32.mrf.mxu2  ;;  %v1059_v60 = vpop.f32.mrf.mxu3 }
 0x10a   : > { %v1171_v16 = vmax.f32 %v1085_v13, %v1163_v7  ;;  %v974_v18 = vadd.f32 %v2946_v43, %v973_v62  ;;  %v1060_v19 = vadd.f32 %v2946_v43, %v1059_v60  ;;  %v812_v7 = vadd.f32 %v2946_v43, %v3054_v61 }
 0x10c   : > { %v3112_v23 = vmax.f32 %v1171_v16, %v1249_v15  ;;  %v992_v9 = vmax.f32 %v974_v18, 0.0  ;;  %v1078_v27 = vmax.f32 %v1060_v19, 0.0  ;;  %v898_v16 = vadd.f32 %v2946_v43, %v3057_v1 }
 0x10d   : > { %v824_v18 = vmax.f32 %v812_v7, 0.0 }
 0x10e   : > { %v1148_v25 = vpop.f32.mrf.mxu0  ;;  %v1000_v14 = vmax.f32 %v914_v22, %v992_v9  ;;  %2521 = vmatmul.msk.bf16.gmra.mxu2 %vm434_vm2, %v2660_v20  ;;  %2549 = vmatmul.msk.bf16.gmra.mxu3 %vm434_vm2, %v2664_v8  ;;  %v1234_v17 = vpop.f32.mrf.mxu1 }
 0x10f   : > { %v1149_v38 = vadd.f32 %v2946_v43, %v1148_v25  ;;  %v1235_v26 = vadd.f32 %v2946_v43, %v1234_v17 }
 0x110   : > { %v3118_v31 = vmax.f32 %v1000_v14, %v1078_v27  ;;  %v832_v14 = vmax.f32 %v3070_v21, %v824_v18  ;;  %v910_v27 = vmax.f32 %v898_v16, 0.0 }
 0x111   : > { %v976_v33 = vpop.f32.mrf.mxu2  ;;  %v1062_v34 = vpop.f32.mrf.mxu3  ;;  %v1165_v49 = vmax.f32 %v1149_v38, 0.0  ;;  %v1251_v54 = vmax.f32 %v1235_v26, 0.0  ;;  %v2662_v38 = vld [vmem:[%s2827_s18 + $0x1d8] sm:$0xff] }
 0x112   : > { %v977_v36 = vadd.f32 %v2946_v43, %v976_v33  ;;  %v1063_v37 = vadd.f32 %v2946_v43, %v1062_v34  ;;  %v918_v42 = vmax.f32 %v832_v14, %v910_v27 }
 0x114   : > { %v993_v44 = vmax.f32 %v977_v36, 0.0  ;;  %v1079_v24 = vmax.f32 %v1063_v37, 0.0 }
 0x116   : > { %v3126_v45 = vpop.f32.mrf.mxu0  ;;  %v1001_v46 = vmax.f32 %v3039_v41, %v993_v44  ;;  %v3129_v51 = vpop.f32.mrf.mxu1 }
 0x118   : > { %v1087_v53 = vmax.f32 %v1001_v46, %v1079_v24  ;;  %v817_v46 = vadd.f32 %v2946_v43, %v3078_v32 }
 0x119   : > { %v978_v30 = vpop.f32.mrf.mxu2  ;;  %v1064_v55 = vpop.f32.mrf.mxu3 }
 0x11a   : > { %v1173_v57 = vmax.f32 %v1087_v53, %v1165_v49  ;;  %v979_v59 = vadd.f32 %v2946_v43, %v978_v30  ;;  %v1065_v63 = vadd.f32 %v2946_v43, %v1064_v55 }
 0x11c   : > { %v3136_v3 = vmax.f32 %v1173_v57, %v1251_v54  ;;  %v994_v41 = vmax.f32 %v979_v59, 0.0  ;;  %v1080_v6 = vmax.f32 %v1065_v63, 0.0  ;;  %v903_v57 = vadd.f32 %v2946_v43, %v3081_v35 }
 0x11d   : > { %v826_v59 = vmax.f32 %v817_v46, 0.0 }
 0x11e   : > { %v1153_v4 = vpop.f32.mrf.mxu0  ;;  %v1002_v58 = vmax.f32 %v916_v2, %v994_v41  ;;  %2522 = vmatmul.msk.bf16.gmra.mxu2 %vm434_vm2, %v2661_v0  ;;  %2550 = vmatmul.msk.bf16.gmra.mxu3 %vm434_vm2, %v2665_v47  ;;  %v1239_v50 = vpop.f32.mrf.mxu1 }
 0x11f   : > { %v1154_v60 = vadd.f32 %v2946_v43, %v1153_v4  ;;  %v1240_v61 = vadd.f32 %v2946_v43, %v1239_v50  ;;  %v834_v41 = vmax.f32 %v3094_v40, %v826_v59  ;;  %v912_v4 = vmax.f32 %v903_v57, 0.0  ;;  %v2668_v50 = vld [vmem:[%s3375_s4 + $0x8] sm:$0xff] }
 0x120   : > { %v3142_v11 = vmax.f32 %v1002_v58, %v1080_v6  ;;  %1824 = vmatpush.bf16.msra.mxu0 %v2668_v50 }
 0x121   : > { %v981_v56 = vpop.f32.mrf.mxu2  ;;  %v1067_v13 = vpop.f32.mrf.mxu3  ;;  %v1167_v9 = vmax.f32 %v1154_v60, 0.0  ;;  %v1253_v29 = vmax.f32 %v1240_v61, 0.0 }
 0x122   : > { %v982_v15 = vadd.f32 %v2946_v43, %v981_v56  ;;  %v1068_v62 = vadd.f32 %v2946_v43, %v1067_v13 }
 0x124   : > { %v995_v19 = vmax.f32 %v982_v15, 0.0  ;;  %v1081_v20 = vmax.f32 %v1068_v62, 0.0  ;;  %v920_v62 = vmax.f32 %v834_v41, %v912_v4 }
 0x126   : > { %v3150_v8 = vpop.f32.mrf.mxu0  ;;  %v1003_v22 = vmax.f32 %v3063_v12, %v995_v19  ;;  %v3153_v25 = vpop.f32.mrf.mxu1 }
 0x128   : > { %v1089_v17 = vmax.f32 %v1003_v22, %v1081_v20 }
 0x129   : > { %v983_v1 = vpop.f32.mrf.mxu2  ;;  %v1069_v33 = vpop.f32.mrf.mxu3 }
 0x12a   : > { %v1175_v34 = vmax.f32 %v1089_v17, %v1167_v9  ;;  %v984_v36 = vadd.f32 %v2946_v43, %v983_v1  ;;  %v1070_v37 = vadd.f32 %v2946_v43, %v1069_v33 }
 0x12c   : > { %v3160_v44 = vmax.f32 %v1175_v34, %v1253_v29  ;;  %v996_v12 = vmax.f32 %v984_v36, 0.0  ;;  %v1082_v26 = vmax.f32 %v1070_v37, 0.0 }
 0x12e   : > { %v1004_v24 = vmax.f32 %v918_v42, %v996_v12  ;;  %2523 = vmatmul.msk.bf16.gmra.mxu2 %vm434_vm2, %v2662_v38  ;;  %2551 = vmatmul.msk.bf16.gmra.mxu3 %vm434_vm2, %v2666_v39  ;;  %v1158_v21 = vpop.f32.mrf.mxu0  ;;  %v1244_v28 = vpop.f32.mrf.mxu1 }
 0x12f   : > { %v1159_v55 = vadd.f32 %v2946_v43, %v1158_v21  ;;  %v1245_v47 = vadd.f32 %v2946_v43, %v1244_v28 }
 0x130   : > { %v3166_v49 = vmax.f32 %v1004_v24, %v1082_v26 }
 0x131   : > { %v986_v52 = vpop.f32.mrf.mxu2  ;;  %v1072_v53 = vpop.f32.mrf.mxu3  ;;  %v1169_v2 = vmax.f32 %v1159_v55, 0.0  ;;  %v1255_v6 = vmax.f32 %v1245_v47, 0.0 }
 0x132   : > { %v987_v54 = vadd.f32 %v2946_v43, %v986_v52  ;;  %v1073_v30 = vadd.f32 %v2946_v43, %v1072_v53 }
 0x134   : > { %v997_v63 = vmax.f32 %v987_v54, 0.0  ;;  %v1083_v0 = vmax.f32 %v1073_v30, 0.0 }
 0x136   : > { %v1005_v32 = vmax.f32 %v3087_v48, %v997_v63  ;;  %v3198_v21 = vpop.f32.mrf.mxu0  ;;  %v3200_v46 = vpop.f32.mrf.mxu1 }
 0x138   : > { %v1091_v58 = vmax.f32 %v1005_v32, %v1083_v0 }
 0x139   : > { %v988_v7 = vpop.f32.mrf.mxu2  ;;  %v1074_v56 = vpop.f32.mrf.mxu3 }
 0x13a   : > { %v1177_v35 = vmax.f32 %v1091_v58, %v1169_v2  ;;  %v989_v13 = vadd.f32 %v2946_v43, %v988_v7  ;;  %v1075_v15 = vadd.f32 %v2946_v43, %v1074_v56  ;;  %v1146_v2 = vadd.f32 %v2946_v43, %v3102_v5 }
 0x13c   : > { %v1263_v48 = vmax.f32 %v1177_v35, %v1255_v6  ;;  %v998_v60 = vmax.f32 %v989_v13, 0.0  ;;  %v1084_v40 = vmax.f32 %v1075_v15, 0.0  ;;  %v1164_v56 = vmax.f32 %v1146_v2, 0.0 }
 0x13d   : > { %v1232_v35 = vadd.f32 %v2946_v43, %v3105_v10 }
 0x13e   : > { %v1006_v16 = vmax.f32 %v920_v62, %v998_v60  ;;  %v1487_v55 = vpop.f32.mrf.mxu0  ;;  %v1573_v47 = vpop.f32.mrf.mxu1  ;;  %v1172_v5 = vmax.f32 %v3118_v31, %v1164_v56 }
 0x13f   : > { %v1250_v60 = vmax.f32 %v1232_v35, 0.0 }
 0x140   : > { %v3181_v18 = vmax.f32 %v1006_v16, %v1084_v40 }
 0x141   : > { %v1315_v19 = vpop.f32.mrf.mxu2  ;;  %v1401_v20 = vpop.f32.mrf.mxu3 }
 0x142   : > { %v1316_v61 = vadd.f32 %v2946_v43, %v1315_v19  ;;  %v1402_v22 = vadd.f32 %v2946_v43, %v1401_v20 }
 0x144   : > { %v1335_v9 = vmax.f32 %v1316_v61, 0.0  ;;  %v1421_v14 = vmax.f32 %v1402_v22, 0.0  ;;  %v1258_v61 = vmax.f32 %v1172_v5, %v1250_v60 }
 0x146   : > { %v1343_v27 = vmax.f32 %v3112_v23, %v1335_v9  ;;  %v2667_v23 = vld [vmem:[%s3375_s4] sm:$0xff]  ;;  %v1489_v32 = vpop.f32.mrf.mxu0  ;;  %v1575_v50 = vpop.f32.mrf.mxu1  ;;  %v1488_v9 = vadd.f32 %v2946_v43, %v1487_v55 }
 0x147   : > { %1825 = vmatpush.bf16.msra.mxu0 %v2667_v23 }
 0x148   : > { %v3186_v17 = vmax.f32 %v1343_v27, %v1421_v14  ;;  %v1490_v14 = vadd.f32 %v2946_v43, %v1489_v32  ;;  %v1151_v27 = vadd.f32 %v2946_v43, %v3126_v45 }
 0x149   : > { %v1317_v29 = vpop.f32.mrf.mxu2  ;;  %v1403_v1 = vpop.f32.mrf.mxu3 }
 0x14a   : > { %v1318_v15 = vadd.f32 %v2946_v43, %v1317_v29  ;;  %v1404_v22 = vadd.f32 %v2946_v43, %v1403_v1  ;;  %v1166_v23 = vmax.f32 %v1151_v27, 0.0 }
 0x14c   : > { %v1336_v20 = vmax.f32 %v1318_v15, 0.0  ;;  %v1422_v31 = vmax.f32 %v1404_v22, 0.0  ;;  %v1156_v22 = vadd.f32 %v2946_v43, %v3150_v8  ;;  %v1242_v8 = vadd.f32 %v2946_v43, %v3153_v25 }
 0x14e   : > { %v1492_v19 = vpop.f32.mrf.mxu0  ;;  %v1578_v10 = vpop.f32.mrf.mxu1 }
 0x14f   : > { %v1493_v56 = vadd.f32 %v2946_v43, %v1492_v19  ;;  %v1579_v19 = vadd.f32 %v2946_v43, %v1578_v10 }
 0x151   : > { %v1320_v33 = vpop.f32.mrf.mxu2  ;;  %v1406_v34 = vpop.f32.mrf.mxu3 }
 0x152   : > { %v1321_v36 = vadd.f32 %v2946_v43, %v1320_v33  ;;  %v1407_v37 = vadd.f32 %v2946_v43, %v1406_v34  ;;  %v1507_v34 = vmax.f32 %v1488_v9, 0.0 }
 0x154   : > { %v1337_v38 = vmax.f32 %v1321_v36, 0.0  ;;  %v1423_v39 = vmax.f32 %v1407_v37, 0.0  ;;  %v1574_v36 = vadd.f32 %v2946_v43, %v1573_v47  ;;  %v1174_v47 = vmax.f32 %v3142_v11, %v1166_v23 }
 0x156   : > { %v1345_v42 = vmax.f32 %v3136_v3, %v1337_v38  ;;  %v1508_v38 = vmax.f32 %v1490_v14, 0.0  ;;  %v1494_v1 = vpop.f32.mrf.mxu0  ;;  %v1593_v45 = vmax.f32 %v1574_v36, 0.0  ;;  %v1509_v14 = vmax.f32 %v1493_v56, 0.0 }
 0x157   : > { %v1495_v60 = vadd.f32 %v2946_v43, %v1494_v1 }
 0x158   : > { %v3191_v12 = vmax.f32 %v1345_v42, %v1423_v39  ;;  %v1576_v39 = vadd.f32 %v2946_v43, %v1575_v50 }
 0x159   : > { %v1322_v24 = vpop.f32.mrf.mxu2  ;;  %v3196_v26 = vpop.f32.mrf.mxu3 }
 0x15a   : > { %v1409_v35 = vadd.f32 %v2946_v43, %v3196_v26 }
 0x15c   : > { %v1424_v27 = vmax.f32 %v1409_v35, 0.0 }
 0x15e   : > { %v1497_v11 = vpop.f32.mrf.mxu0 }
 0x161   : > { %v1325_v28 = vpop.f32.mrf.mxu2  ;;  %v1411_v52 = vpop.f32.mrf.mxu3 }
 0x162   : > { %v1326_v53 = vadd.f32 %v2946_v43, %v1325_v28  ;;  %v1412_v3 = vadd.f32 %v2946_v43, %v1411_v52  ;;  %v1237_v28 = vadd.f32 %v2946_v43, %v3129_v51  ;;  %v1515_v52 = vmax.f32 %v3186_v17, %v1507_v34 }
 0x164   : > { %v1339_v54 = vmax.f32 %v1326_v53, 0.0  ;;  %v1425_v30 = vmax.f32 %v1412_v3, 0.0  ;;  %v1594_v3 = vmax.f32 %v1576_v39, 0.0  ;;  %v1252_v32 = vmax.f32 %v1237_v28, 0.0 }
 0x165   : > { %v1595_v39 = vmax.f32 %v1579_v19, 0.0 }
 0x166   : > { %v1347_v57 = vmax.f32 %v3160_v44, %v1339_v54  ;;  %v1323_v54 = vadd.f32 %v2946_v43, %v1322_v24  ;;  %v1260_v24 = vmax.f32 %v1174_v47, %v1252_v32  ;;  %v1499_v23 = vpop.f32.mrf.mxu0 }
 0x168   : > { %v3205_v59 = vmax.f32 %v1347_v57, %v1425_v30  ;;  %v1580_v30 = vpop.f32.mrf.mxu1 }
 0x169   : > { %v3207_v63 = vpop.f32.mrf.mxu2  ;;  %v3209_v0 = vpop.f32.mrf.mxu3  ;;  %v1581_v34 = vadd.f32 %v2946_v43, %v1580_v30 }
 0x16a   : > { %v1328_v10 = vadd.f32 %v2946_v43, %v3207_v63 }
 0x171   : > { %v1330_v41 = vpop.f32.mrf.mxu2  ;;  %v1416_v4 = vpop.f32.mrf.mxu3 }
 0x172   : > { %v1331_v58 = vadd.f32 %v2946_v43, %v1330_v41  ;;  %v1417_v6 = vadd.f32 %v2946_v43, %v1416_v4  ;;  %v1601_v4 = vmax.f32 %v1515_v52, %v1593_v45 }
 0x174   : > { %v1341_v7 = vmax.f32 %v1331_v58, 0.0  ;;  %v1427_v44 = vmax.f32 %v1417_v6, 0.0  ;;  %v1338_v6 = vmax.f32 %v1323_v54, 0.0 }
 0x176   : > { %v1349_v13 = vmax.f32 %v1263_v48, %v1341_v7  ;;  %v1344_v48 = vmax.f32 %v1258_v61, %v1336_v20  ;;  %v1346_v5 = vmax.f32 %v1260_v24, %v1338_v6  ;;  %v1500_v6 = vadd.f32 %v2946_v43, %v1499_v23 }
 0x178   : > { %v3218_v62 = vmax.f32 %v1349_v13, %v1427_v44  ;;  %v1430_v37 = vmax.f32 %v1344_v48, %v1422_v31  ;;  %v1583_v31 = vpop.f32.mrf.mxu1 }
 0x179   : > { %v3221_v16 = vpop.f32.mrf.mxu2  ;;  %v3223_v40 = vpop.f32.mrf.mxu3 }
 0x17a   : > { %v1516_v53 = vmax.f32 %v1430_v37, %v1508_v38  ;;  %v1168_v37 = vmax.f32 %v1156_v22, 0.0  ;;  %v1517_v38 = vmax.f32 %v3191_v12, %v1509_v14 }
 0x17c   : > { %v1602_v17 = vmax.f32 %v1516_v53, %v1594_v3  ;;  %v1176_v45 = vmax.f32 %v3166_v49, %v1168_v37  ;;  %v1254_v53 = vmax.f32 %v1242_v8, 0.0  ;;  %v1603_v30 = vmax.f32 %v1517_v38, %v1595_v39 }
 0x17d   : > { %v1498_v49 = vadd.f32 %v2946_v43, %v1497_v11 }
 0x180   : > { %v1585_v47 = vpop.f32.mrf.mxu1 }
 0x181   : > { %v1659_v29 = vpop.f32.mrf.mxu2  ;;  %v1745_v33 = vpop.f32.mrf.mxu3  ;;  %v1586_v11 = vadd.f32 %v2946_v43, %v1585_v47 }
 0x182   : > { %v1660_v42 = vadd.f32 %v2946_v43, %v1659_v29  ;;  %v1746_v57 = vadd.f32 %v2946_v43, %v1745_v33  ;;  %v1432_v29 = vmax.f32 %v1346_v5, %v1424_v27  ;;  %v1510_v33 = vmax.f32 %v1495_v60, 0.0  ;;  %v2675_v27 = vld [vmem:[%s3377_s6 + $0x30] sm:$0xff] }
 0x183   : > { %v1512_v60 = vmax.f32 %v1500_v6, 0.0 }
 0x184   : > { %v1679_v55 = vmax.f32 %v1660_v42, 0.0  ;;  %v1765_v7 = vmax.f32 %v1746_v57, 0.0  ;;  %v1518_v1 = vmax.f32 %v1432_v29, %v1510_v33  ;;  %v1596_v42 = vmax.f32 %v1581_v34, 0.0 }
 0x186   : > { %v1687_v50 = vmax.f32 %v1601_v4, %v1679_v55  ;;  %v1340_v55 = vmax.f32 %v1328_v10, 0.0  ;;  %v1604_v57 = vmax.f32 %v1518_v1, %v1596_v42  ;;  %v1414_v4 = vadd.f32 %v2946_v43, %v3209_v0  ;;  %v2674_v10 = vld [vmem:[%s3377_s6 + $0x28] sm:$0xff] }
 0x188   : > { %v1773_v20 = vmax.f32 %v1687_v50, %v1765_v7  ;;  %v1426_v24 = vmax.f32 %v1414_v4, 0.0  ;;  %v1588_v19 = vpop.f32.mrf.mxu1 }
 0x189   : > { %v1661_v2 = vpop.f32.mrf.mxu2  ;;  %v1747_v41 = vpop.f32.mrf.mxu3 }
 0x18a   : > { %v1662_v58 = vadd.f32 %v2946_v43, %v1661_v2  ;;  %v1748_v51 = vadd.f32 %v2946_v43, %v1747_v41  ;;  %v1262_v41 = vmax.f32 %v1176_v45, %v1254_v53 }
 0x18c   : > { %v1680_v44 = vmax.f32 %v1662_v58, 0.0  ;;  %v1766_v15 = vmax.f32 %v1748_v51, 0.0 }
 0x18e   : > { %v1688_v13 = vmax.f32 %v1602_v17, %v1680_v44  ;;  %v1348_v17 = vmax.f32 %v1262_v41, %v1340_v55  ;;  %v1161_v44 = vadd.f32 %v2946_v43, %v3198_v21  ;;  %v2676_v21 = vld [vmem:[%s3377_s6 + $0x38] sm:$0xff] }
 0x18f   : > { %1927 = vmatpush.bf16.msra.mxu1 %v2676_v21 }
 0x190   : > { %v1774_v61 = vmax.f32 %v1688_v13, %v1766_v15  ;;  %v1511_v13 = vmax.f32 %v1498_v49, 0.0  ;;  %v1584_v15 = vadd.f32 %v2946_v43, %v1583_v31  ;;  %v1434_v0 = vmax.f32 %v1348_v17, %v1426_v24  ;;  %v1590_v55 = vpop.f32.mrf.mxu1  ;;  %v2672_v49 = vld [vmem:[%s3377_s6 + $0x18] sm:$0xff] }
 0x191   : > { %v1664_v9 = vpop.f32.mrf.mxu2  ;;  %v1750_v48 = vpop.f32.mrf.mxu3 }
 0x192   : > { %v1781_v26 = vpack.c.bf16 %v1774_v61, %v1773_v20  ;;  %v1665_v36 = vadd.f32 %v2946_v43, %v1664_v9  ;;  %v1751_v52 = vadd.f32 %v2946_v43, %v1750_v48  ;;  %v1502_v20 = vpop.f32.mrf.mxu0  ;;  %v3271_v61 = vld [vmem:[%s3374_s3] ss:$0 sm:$0xff]  ;;  %v1170_v9 = vmax.f32 %v1161_v44, 0.0  ;;  %v2671_v44 = vld [vmem:[%s3377_s6 + $0x10] sm:$0xff] }
 0x193   : > { %v1247_v48 = vadd.f32 %v3271_v61, %v3200_v46  ;;  %v1597_v14 = vmax.f32 %v1584_v15, 0.0  ;;  %v1520_v31 = vmax.f32 %v1434_v0, %v1512_v60  ;;  %v1333_v29 = vadd.f32 %v3271_v61, %v3221_v16  ;;  %1928 = vmatpush.bf16.msra.mxu1 %v2675_v27 }
 0x194   : > { %2560 = vmatmul.msk.bf16.vlgmr.msra.gmra.mxu0 %vm1805_vm3, %v1781_v26  ;;  %v1681_v28 = vmax.f32 %v1665_v36, 0.0  ;;  %v1767_v32 = vmax.f32 %v1751_v52, 0.0  ;;  %v1598_v26 = vmax.f32 %v1586_v11, 0.0  ;;  %v1178_v36 = vmax.f32 %v3181_v18, %v1170_v9 }
 0x195   : > { %v1256_v46 = vmax.f32 %v1247_v48, 0.0  ;;  %v1342_v16 = vmax.f32 %v1333_v29, 0.0  ;;  %v1503_v45 = vadd.f32 %v3271_v61, %v1502_v20  ;;  %v1419_v53 = vadd.f32 %v3271_v61, %v3223_v40 }
 0x196   : > { %v1689_v63 = vmax.f32 %v1603_v30, %v1681_v28  ;;  %v1606_v1 = vmax.f32 %v1520_v31, %v1598_v26  ;;  %v2673_v30 = vld [vmem:[%s3377_s6 + $0x20] sm:$0xff]  ;;  %v1589_v41 = vadd.f32 %v3271_v61, %v1588_v19  ;;  %v1591_v17 = vadd.f32 %v3271_v61, %v1590_v55 }
 0x197   : > { %v1264_v52 = vmax.f32 %v1178_v36, %v1256_v46  ;;  %1929 = vmatpush.bf16.msra.mxu1 %v2674_v10  ;;  %v1428_v4 = vmax.f32 %v1419_v53, 0.0  ;;  %v2709_v26 = vld [vmem:[%s3376_s5] ss:$0 sm:$0xff] }
 0x198   : > { %v1775_v50 = vmax.f32 %v1689_v63, %v1767_v32 }
 0x199   : > { %v1666_v3 = vpop.f32.mrf.mxu2  ;;  %v1752_v54 = vpop.f32.mrf.mxu3 }
 0x19a   : > { %v1667_v25 = vadd.f32 %v2946_v43, %v1666_v3  ;;  %v1753_v12 = vadd.f32 %v2946_v43, %v1752_v54  ;;  %v1519_v43 = vmax.f32 %v3205_v59, %v1511_v13  ;;  %v1504_v18 = vpop.f32.mrf.mxu0 }
 0x19b   : > { %1930 = vmatpush.bf16.msra.mxu1 %v2673_v30 }
 0x19c   : > { %v1682_v2 = vmax.f32 %v1667_v25, 0.0  ;;  %v1768_v51 = vmax.f32 %v1753_v12, 0.0  ;;  %v1605_v8 = vmax.f32 %v1519_v43, %v1597_v14  ;;  %v1350_v25 = vmax.f32 %v1264_v52, %v1342_v16 }
 0x19d   : > { %v1505_v12 = vadd.f32 %v3271_v61, %v1504_v18 }
 0x19e   : > { %v1690_v58 = vmax.f32 %v1604_v57, %v1682_v2  ;;  %v1513_v2 = vmax.f32 %v1503_v45, 0.0 }
 0x19f   : > { %1931 = vmatpush.bf16.msra.mxu1 %v2672_v49  ;;  %v1957_v49 = vld [vmem:[%s3328_s12 + $0x8] sm:$0xff] }
 0x1a0   : > { %v1776_v7 = vmax.f32 %v1690_v58, %v1768_v51  ;;  %v1436_v58 = vmax.f32 %v1350_v25, %v1428_v4  ;;  %v1514_v51 = vmax.f32 %v1505_v12, 0.0 }
 0x1a1   : > { %v1669_v56 = vpop.f32.mrf.mxu2  ;;  %v1755_v35 = vpop.f32.mrf.mxu3 }
 0x1a2   : > { %v1782_v5 = vpack.c.bf16 %v1776_v7, %v1775_v50  ;;  %v1670_v22 = vadd.f32 %v3271_v61, %v1669_v56  ;;  %v1756_v34 = vadd.f32 %v3271_v61, %v1755_v35  ;;  %v1521_v50 = vmax.f32 %v3218_v62, %v1513_v2  ;;  %v2670_v62 = vld [vmem:[%s3377_s6 + $0x8] sm:$0xff] }
 0x1a3   : > { %v1599_v7 = vmax.f32 %v1589_v41, 0.0  ;;  %v1522_v24 = vmax.f32 %v1436_v58, %v1514_v51  ;;  %v1600_v56 = vmax.f32 %v1591_v17, 0.0  ;;  %1932 = vmatpush.bf16.msra.mxu1 %v2671_v44 }
 0x1a4   : > { %2561 = vmatmul.msk.bf16.gmra.mxu0 %vm1805_vm3, %v1782_v5  ;;  %v1683_v33 = vmax.f32 %v1670_v22, 0.0  ;;  %v1769_v23 = vmax.f32 %v1756_v34, 0.0 }
 0x1a5   : > { %v1607_v0 = vmax.f32 %v1521_v50, %v1599_v7  ;;  %v1608_v20 = vmax.f32 %v1522_v24, %v1600_v56  ;;  %v1958_v50 = vld [vmem:[%s3328_s12 + $0x10] sm:$0xff] }
 0x1a6   : > { %v1691_v42 = vmax.f32 %v1605_v8, %v1683_v33 }
 0x1a7   : > { %1933 = vmatpush.bf16.msra.mxu1 %v2670_v62 }
 0x1a8   : > { %v1777_v57 = vmax.f32 %v1691_v42, %v1769_v23 }
 0x1a9   : > { %v1671_v37 = vpop.f32.mrf.mxu2  ;;  %v1757_v59 = vpop.f32.mrf.mxu3 }
 0x1aa   : > { %v1672_v38 = vadd.f32 %v3271_v61, %v1671_v37  ;;  %v1758_v39 = vadd.f32 %v3271_v61, %v1757_v59 }
 0x1ac   : > { %v1684_v28 = vmax.f32 %v1672_v38, 0.0  ;;  %v1770_v54 = vmax.f32 %v1758_v39, 0.0 }
 0x1ae   : > { %v1692_v3 = vmax.f32 %v1606_v1, %v1684_v28 }
 0x1b0   : > { %v1778_v47 = vmax.f32 %v1692_v3, %v1770_v54 }
 0x1b1   : > { %v1674_v63 = vpop.f32.mrf.mxu2  ;;  %v1760_v32 = vpop.f32.mrf.mxu3 }
 0x1b2   : > { %v1783_v40 = vpack.c.bf16 %v1778_v47, %v1777_v57  ;;  %v1675_v6 = vadd.f32 %v3271_v61, %v1674_v63  ;;  %v1761_v13 = vadd.f32 %v3271_v61, %v1760_v32  ;;  %v2710_v47 = vld [vmem:[%s3378_s7] ss:$0 sm:$0xff] }
 0x1b3   : > { %v1956_v32 = vld [vmem:[%s3328_s12] sm:$0xff] }
 0x1b4   : > { %2562 = vmatmul.msk.bf16.gmra.mxu0 %vm1805_vm3, %v1783_v40  ;;  %v1685_v35 = vmax.f32 %v1675_v6, 0.0  ;;  %v1771_v21 = vmax.f32 %v1761_v13, 0.0 }
 0x1b6   : > { %v1693_v22 = vmax.f32 %v1607_v0, %v1685_v35  ;;  %v1959_v35 = vld [vmem:[%s3328_s12 + $0x18] sm:$0xff] }
 0x1b8   : > { %v1779_v14 = vmax.f32 %v1693_v22, %v1771_v21  ;;  %v1961_v21 = vld [vmem:[%s3328_s12 + $0x28] sm:$0xff] }
 0x1b9   : > { %v1676_v15 = vpop.f32.mrf.mxu2  ;;  %v1762_v5 = vpop.f32.mrf.mxu3 }
 0x1ba   : > { %v1677_v60 = vadd.f32 %v3271_v61, %v1676_v15  ;;  %v1763_v11 = vadd.f32 %v3271_v61, %v1762_v5  ;;  %v2669_v61 = vld [vmem:[%s3377_s6] sm:$0xff] }
 0x1bb   : > { %1934 = vmatpush.bf16.msra.mxu1 %v2669_v61 }
 0x1bc   : > { %v1686_v9 = vmax.f32 %v1677_v60, 0.0  ;;  %v1772_v43 = vmax.f32 %v1763_v11, 0.0  ;;  %v1960_v60 = vld [vmem:[%s3328_s12 + $0x20] sm:$0xff] }
 0x1be   : > { %v1694_v48 = vmax.f32 %v1608_v20, %v1686_v9 }
 0x1c0   : > { %v1780_v19 = vmax.f32 %v1694_v48, %v1772_v43 }
 0x1c2   : > { %v1784_v27 = vpack.c.bf16 %v1780_v19, %v1779_v14  ;;  %v1962_v19 = vld [vmem:[%s3328_s12 + $0x30] sm:$0xff] }
 0x1c4   : > { %2563 = vmatmul.msk.bf16.gmra.mxu0 %vm1805_vm3, %v1784_v27 }
 0x211   : > { %v1827_v31 = vpop.f32.mrf.mxu0 }
 0x212   : > { %v1828_v29 = vadd.f32 %v2709_v26, %v1827_v31 }
 0x214   : > { %v1847_v36 = vmax.f32 %v1828_v29, 0.0  ;;  %v1963_v29 = vld [vmem:[%s3328_s12 + $0x38] sm:$0xff] }
 0x219   : > { %v1829_v33 = vpop.f32.mrf.mxu0 }
 0x21a   : > { %v1830_v34 = vadd.f32 %v2709_v26, %v1829_v33 }
 0x21c   : > { %v1848_v46 = vmax.f32 %v1830_v34, 0.0 }
 0x21e   : > { %v1855_v37 = vpack.c.bf16 %v1848_v46, %v1847_v36 }
 0x220   : > { %1935 = vmatmul.bf16.vlgmr.msra.gmra.mxu1 %v1855_v37 }
 0x221   : > { %v1832_v59 = vpop.f32.mrf.mxu0 }
 0x222   : > { %v1833_v8 = vadd.f32 %v2709_v26, %v1832_v59 }
 0x224   : > { %v1849_v10 = vmax.f32 %v1833_v8, 0.0 }
 0x229   : > { %v1834_v38 = vpop.f32.mrf.mxu0 }
 0x22a   : > { %v1835_v39 = vadd.f32 %v2709_v26, %v1834_v38 }
 0x22c   : > { %v1850_v1 = vmax.f32 %v1835_v39, 0.0 }
 0x22e   : > { %v1856_v16 = vpack.c.bf16 %v1850_v1, %v1849_v10 }
 0x230   : > { %1940 = vmatmul.bf16.gmra.mxu1 %v1856_v16 }
 0x231   : > { %v1837_v42 = vpop.f32.mrf.mxu0 }
 0x232   : > { %v1838_v23 = vadd.f32 %v2709_v26, %v1837_v42 }
 0x234   : > { %v1851_v18 = vmax.f32 %v1838_v23, 0.0 }
 0x239   : > { %v1839_v28 = vpop.f32.mrf.mxu0 }
 0x23a   : > { %v1840_v52 = vadd.f32 %v2709_v26, %v1839_v28 }
 0x23c   : > { %v1852_v45 = vmax.f32 %v1840_v52, 0.0 }
 0x23e   : > { %v1857_v53 = vpack.c.bf16 %v1852_v45, %v1851_v18 }
 0x240   : > { %1945 = vmatmul.bf16.gmra.mxu1 %v1857_v53 }
 0x241   : > { %v1842_v3 = vpop.f32.mrf.mxu0 }
 0x242   : > { %v1843_v54 = vadd.f32 %v2709_v26, %v1842_v3 }
 0x244   : > { %v1853_v12 = vmax.f32 %v1843_v54, 0.0 }
 0x249   : > { %v1844_v30 = vpop.f32.mrf.mxu0 }
 0x24a   : > { %v1845_v25 = vadd.f32 %v2709_v26, %v1844_v30 }
 0x24c   : > { %v1854_v55 = vmax.f32 %v1845_v25, 0.0 }
 0x24e   : > { %v1858_v57 = vpack.c.bf16 %v1854_v55, %v1853_v12 }
 0x250   : > { %1950 = vmatmul.bf16.gmra.mxu1 %v1858_v57 }
 0x29d   : > { %v1936_v63 = vpop.f32.mrf.mxu1 }
 0x29e   : > { %v1937_v2 = vadd.f32 %v2710_v47, %v1936_v63 }
 0x2a0   : > { %v1964_v41 = vadd.f32 %v1956_v32, %v1937_v2 }
 0x2a2   : > { %v1972_v4 = vmax.f32 %v1964_v41, 0.0 }
 0x2a4   : > { %1980 = vst.msk [vmem:[%s3337_s27] sm:$0xff] %vm1805_vm3, %v1972_v4 }
 0x2a5   : > { %v1938_v40 = vpop.f32.mrf.mxu1 }
 0x2a6   : > { %v1939_v58 = vadd.f32 %v2710_v47, %v1938_v40 }
 0x2a8   : > { %v1965_v51 = vadd.f32 %v1957_v49, %v1939_v58 }
 0x2aa   : > { %v1973_v17 = vmax.f32 %v1965_v51, 0.0 }
 0x2ac   : > { %1981 = vst.msk [vmem:[%s3337_s27 + $0x8] sm:$0xff] %vm1805_vm3, %v1973_v17 }
 0x2ad   : > { %v1941_v6 = vpop.f32.mrf.mxu1 }
 0x2ae   : > { %v1942_v7 = vadd.f32 %v2710_v47, %v1941_v6 }
 0x2b0   : > { %v1966_v44 = vadd.f32 %v1958_v50, %v1942_v7 }
 0x2b2   : > { %v1974_v24 = vmax.f32 %v1966_v44, 0.0 }
 0x2b4   : > { %1982 = vst.msk [vmem:[%s3337_s27 + $0x10] sm:$0xff] %vm1805_vm3, %v1974_v24 }
 0x2b5   : > { %v1943_v56 = vpop.f32.mrf.mxu1 }
 0x2b6   : > { %v1944_v13 = vadd.f32 %v2710_v47, %v1943_v56 }
 0x2b8   : > { %v1967_v15 = vadd.f32 %v1959_v35, %v1944_v13 }
 0x2ba   : > { %v1975_v5 = vmax.f32 %v1967_v15, 0.0 }
 0x2bc   : > { %1983 = vst.msk [vmem:[%s3337_s27 + $0x18] sm:$0xff] %vm1805_vm3, %v1975_v5 }
 0x2bd   : > { %v1946_v0 = vpop.f32.mrf.mxu1 }
 0x2be   : > { %v1947_v11 = vadd.f32 %v2710_v47, %v1946_v0 }
 0x2c0   : > { %v1968_v62 = vadd.f32 %v1960_v60, %v1947_v11 }
 0x2c2   : > { %v1976_v20 = vmax.f32 %v1968_v62, 0.0 }
 0x2c4   : > { %1984 = vst.msk [vmem:[%s3337_s27 + $0x20] sm:$0xff] %vm1805_vm3, %v1976_v20 }
 0x2c5   : > { %v1948_v22 = vpop.f32.mrf.mxu1 }
 0x2c6   : > { %v1949_v9 = vadd.f32 %v2710_v47, %v1948_v22 }
 0x2c8   : > { %v1969_v48 = vadd.f32 %v1961_v21, %v1949_v9 }
 0x2ca   : > { %v1977_v43 = vmax.f32 %v1969_v48, 0.0 }
 0x2cc   : > { %1985 = vst.msk [vmem:[%s3337_s27 + $0x28] sm:$0xff] %vm1805_vm3, %v1977_v43 }
 0x2cd   : > { %v1951_v14 = vpop.f32.mrf.mxu1 }
 0x2ce   : > { %v1952_v27 = vadd.f32 %v2710_v47, %v1951_v14 }
 0x2d0   : > { %v1970_v61 = vadd.f32 %v1962_v19, %v1952_v27 }
 0x2d2   : > { %v1978_v31 = vmax.f32 %v1970_v61, 0.0 }
 0x2d4   : > { %1986 = vst.msk [vmem:[%s3337_s27 + $0x30] sm:$0xff] %vm1805_vm3, %v1978_v31 }
 0x2d5   : > { %v1953_v26 = vpop.f32.mrf.mxu1 }
 0x2d6   : > { %v1954_v33 = vadd.f32 %v2710_v47, %v1953_v26 }
 0x2d8   : > { %v1971_v34 = vadd.f32 %v1963_v29, %v1954_v33 }
 0x2da   : > { %v1979_v36 = vmax.f32 %v1971_v34, 0.0 }
 0x2dc   : > { %1987 = vst.msk [vmem:[%s3337_s27 + $0x38] sm:$0xff] %vm1805_vm3, %v1979_v36 }
 0x2dd PF: > { %s18_s29 = sadd.s32 1, %s2734_s29   ;;  %s3380_s27 = smov %s2730_s28 }
 0x2de   : > { %p15_p5 = scmp.ge.s32.totalorder %s18_s29, 4   ;;  %s3381_s28 = smov %s3383_s30 }
 0x2e0   :  { %17 = sbr.rel (!%p15_p5) target bundleno = 2 (0x2), region = 100 }

</bundles_post_ra>
